<compile_context>
chip_gen: v7x
topology: tpu7x:2x2x1
jax: 0.10.0
libtpu: 0.0.40
codegen_flags: <defaults>
</compile_context>

<pallas_src>
import functools

import jax
import jax.numpy as jnp
from jax.experimental import pallas as pl
from jax.experimental.pallas import tpu as pltpu


# ----------------------------------------------------------------------------
# Fused GCN-tower kernel: one grid step == one tower
#   (A_hat, X, W_l, seed ids) -> (normalized H, gathered seed rows)
# ----------------------------------------------------------------------------
def _fused_gcn_kernel(*refs, num_weights, num_seeds):
    seeds_ref = refs[0]                       # SMEM (T, n_seeds) int32 (scalar prefetch)
    adj_ref, x_ref = refs[1], refs[2]         # (N, N), (N, D) bf16 VMEM tiles
    w_refs = refs[3:3 + num_weights]          # (D, D) bf16 weights
    o_ref = refs[3 + num_weights]             # (N, D) normalized hidden states
    seed_o_ref = refs[4 + num_weights]        # (n_seeds, D) gathered seed rows

    cdt = adj_ref.dtype

    # layer 0 (featureless): H1 = A_hat @ X   (f32 accumulate on the MXU).
    # adj_ref is indexed directly inside each dot so the (N,N) operand streams
    # straight from the pipelined input buffer (no extra VMEM temporary).
    h = jnp.dot(adj_ref[...], x_ref[...], preferred_element_type=jnp.float32)
    if num_weights > 0:
        # Fused ReLU + downcast: keep inter-layer activations in bf16 (halves
        # the (N, D) VMEM/vreg footprint; both matmul consumers take bf16).
        h = jnp.maximum(h, 0.0).astype(cdt)

    # layers 1..L-1: H_{l+1} = A_hat @ (H_l @ W_l), ReLU on all but the last.
    for li in range(num_weights):
        hw = jnp.dot(h, w_refs[li][...], preferred_element_type=jnp.float32)
        h = jnp.dot(adj_ref[...], hw.astype(cdt), preferred_element_type=jnp.float32)
        if li != num_weights - 1:
            h = jnp.maximum(h, 0.0).astype(cdt)

    # Fused row-wise L2 normalize: x / max(||x||, 1e-12)  (rsqrt -> EUP, f32).
    # h is f32 here (the last layer is never downcast).
    sumsq = jnp.sum(h * h, axis=-1, keepdims=True)
    inv = jax.lax.rsqrt(jnp.maximum(sumsq, 1e-24))
    o_ref[...] = (h * inv).astype(o_ref.dtype)

    # Fused seed-row gather: read the rows just written to VMEM (bit-exact with
    # the full hidden-state output) using the scalar-prefetched seed indices.
    t = pl.program_id(0)
    for s in range(num_seeds):
        idx = seeds_ref[t, s]
        seed_o_ref[pl.ds(s, 1), :] = o_ref[pl.ds(idx, 1), :]


def fused_gcn_towers(adj_stack, feats_stack, weights, seeds_stack, *,
                     out_dtype=jnp.float32, single_buffer=False):
    """Full GCN stack + L2 normalize + seed gather for T stacked towers.

    adj_stack:   (T, N, N) bf16 normalized adjacency
    feats_stack: (T, N, D) bf16 entity features
    weights:     list of (D, D) bf16 GCN weights for layers 1..L-1 (shared).
    seeds_stack: (T, S) int32 seed entity indices (one row per tower).
    Returns ((T, N, D), (T, S, D)) row-normalized hidden states + seed rows.
    """
    T, N, _ = adj_stack.shape
    D = feats_stack.shape[-1]
    S = seeds_stack.shape[-1]
    num_weights = len(weights)

    def spec(shape, imap, large):
        # On v7x with one tower per TensorCore each core runs exactly one grid
        # step, so double buffering the big operands is pure VMEM waste.
        if single_buffer and large:
            return pl.BlockSpec(shape, imap, pipeline_mode=pl.Buffered(1))
        return pl.BlockSpec(shape, imap)

    in_specs = [
        # Leading tower dim squeezed; blocks cover full arrays, so no K axis,
        # no accumulator scratch, and no (8,128) divisibility constraint.
        spec((None, N, N), lambda t, seeds: (t, 0, 0), True),
        spec((None, N, D), lambda t, seeds: (t, 0, 0), True),
    ] + [pl.BlockSpec((D, D), lambda t, seeds: (0, 0)) for _ in weights]

    out_specs = [
        spec((None, N, D), lambda t, seeds: (t, 0, 0), True),
        pl.BlockSpec((None, S, D), lambda t, seeds: (t, 0, 0)),
    ]

    # Scoped-VMEM limit computed from the actual footprint (default 16/32 MiB
    # would cap N far below what physical VMEM allows), clamped to 64 MiB so it
    # is valid on v7x as well.
    in_bytes = jnp.dtype(adj_stack.dtype).itemsize
    out_bytes = jnp.dtype(out_dtype).itemsize
    bufs = 1 if single_buffer else 2
    footprint = (bufs * (N * N * in_bytes + N * D * in_bytes + N * D * out_bytes)
                 + 2 * S * D * out_bytes
                 + 2 * num_weights * D * D * in_bytes)
    vmem_limit = int(min(max(2 * footprint + (8 << 20), 32 << 20), 64 << 20))

    # Advisory cost estimate so XLA can schedule surrounding ops around us.
    flops = 2 * T * (N * N * D * (1 + num_weights) + N * D * D * num_weights)
    bytes_accessed = (T * (N * N + N * D) * in_bytes
                      + num_weights * D * D * in_bytes
                      + T * (N * D + S * D) * out_bytes
                      + T * S * 4)
    cost = pl.CostEstimate(flops=flops, transcendentals=T * N,
                           bytes_accessed=bytes_accessed)

    kernel = functools.partial(_fused_gcn_kernel,
                               num_weights=num_weights, num_seeds=S)
    return pl.pallas_call(
        kernel,
        out_shape=(jax.ShapeDtypeStruct((T, N, D), out_dtype),
                   jax.ShapeDtypeStruct((T, S, D), out_dtype)),
        grid_spec=pltpu.PrefetchScalarGridSpec(
            num_scalar_prefetch=1,
            grid=(T,),
            in_specs=in_specs,
            out_specs=out_specs,
        ),
        compiler_params=pltpu.CompilerParams(
            # Tower axis is fully independent -> megacore-shardable on v7x.
            dimension_semantics=("parallel",),
            vmem_limit_bytes=vmem_limit,
        ),
        cost_estimate=cost,
    )(seeds_stack, adj_stack, feats_stack, *weights)


def _prefers_single_buffer(num_towers):
    # v7x: 2 TensorCores / 64 MiB VMEM each; with one tower per core double
    # buffering gives zero DMA/compute overlap but doubles the A_hat footprint.
    try:
        kind = jax.devices()[0].device_kind.lower()
    except Exception:
        return False
    return ("v7" in kind) and num_towers <= 2


# ----------------------------------------------------------------------------
# StructureEmbed forward (wrapper) -- no per-call casts / stacks / gathers.
# ----------------------------------------------------------------------------
def structure_embed_forward(params, sr_ent_seeds, tg_ent_seeds):
    adj_stack = params["adj_stack"]        # (2, N, N) bf16, pre-cast + pre-stacked
    feats_stack = params["feats_stack"]    # (2, N, D) bf16, pre-cast + pre-stacked
    weights = params["gcn_weights_bf16"]   # list of (D, D) bf16

    seeds = jnp.stack([sr_ent_seeds.astype(jnp.int32),
                       tg_ent_seeds.astype(jnp.int32)])

    single_buffer = _prefers_single_buffer(adj_stack.shape[0])
    try:
        ent_hid, seed_hid = fused_gcn_towers(
            adj_stack, feats_stack, weights, seeds, single_buffer=single_buffer)
    except Exception:
        # Best-effort fallback if single-buffered pipelining is unsupported.
        if not single_buffer:
            raise
        ent_hid, seed_hid = fused_gcn_towers(
            adj_stack, feats_stack, weights, seeds, single_buffer=False)

    sr_ent_hid, tg_ent_hid = ent_hid[0], ent_hid[1]
    sr_seed_hid, tg_seed_hid = seed_hid[0], seed_hid[1]
    return sr_seed_hid, tg_seed_hid, sr_ent_hid, tg_ent_hid


# ----------------------------------------------------------------------------
# Deterministic parameter / input construction
# ----------------------------------------------------------------------------
def xavier_uniform(key, shape):
    fan_in, fan_out = shape[-2], shape[-1]
    limit = jnp.sqrt(6.0 / (fan_in + fan_out))
    return jax.random.uniform(key, shape, jnp.float32, -limit, limit)


def make_normalized_adj(key, n, avg_deg=4):
    """Dense symmetric-normalized adjacency A_hat = D^-1/2 (A + I) D^-1/2."""
    probs = jax.random.uniform(key, (n, n))
    a = (probs < (avg_deg / n)).astype(jnp.float32)
    a = jnp.maximum(a, a.T)                       # symmetrize
    a = a + jnp.eye(n, dtype=jnp.float32)         # self-loops
    deg = jnp.sum(a, axis=-1)
    d_inv_sqrt = 1.0 / jnp.sqrt(jnp.maximum(deg, 1.0))
    return a * d_inv_sqrt[:, None] * d_inv_sqrt[None, :]


if __name__ == "__main__":
    ent_num_sr, ent_num_tg = 256, 256
    dim = 128
    layer_num = 2
    n_seeds = 8

    key = jax.random.PRNGKey(0)
    k_emb, k_adj_sr, k_adj_tg, k_w, k_seed_sr, k_seed_tg = jax.random.split(key, 6)

    # embedding_weight = xavier_uniform((ent_num_sr + ent_num_tg, dim)), then split
    embedding_weight = xavier_uniform(k_emb, (ent_num_sr + ent_num_tg, dim))
    feats_sr = embedding_weight[:ent_num_sr]
    feats_tg = embedding_weight[ent_num_sr:]

    # GCN weights for layers 1..layer_num-1 (layer 0 is featureless -> no weight)
    w_keys = jax.random.split(k_w, max(layer_num - 1, 1))
    gcn_weights = [xavier_uniform(w_keys[i], (dim, dim)) for i in range(layer_num - 1)]

    edges_sr = make_normalized_adj(k_adj_sr, ent_num_sr)
    edges_tg = make_normalized_adj(k_adj_tg, ent_num_tg)

    # --- init-time hoisting (perf): the f32->bf16 casts and the tower stacking
    # are done ONCE here, never in the forward path. (In training, feats /
    # gcn_weights would keep f32 masters; the bf16 copies are refreshed once per
    # optimizer step, still outside the per-call forward path.)
    params = {
        "adj_stack": jnp.stack([edges_sr, edges_tg]).astype(jnp.bfloat16),
        "feats_stack": jnp.stack([feats_sr, feats_tg]).astype(jnp.bfloat16),
        "gcn_weights_bf16": [w.astype(jnp.bfloat16) for w in gcn_weights],
    }

    sr_ent_seeds = jax.random.randint(k_seed_sr, (n_seeds,), 0, ent_num_sr)
    tg_ent_seeds = jax.random.randint(k_seed_tg, (n_seeds,), 0, ent_num_tg)

    sr_seed_hid, tg_seed_hid, sr_ent_hid, tg_ent_hid = jax.block_until_ready(
        structure_embed_forward(params, sr_ent_seeds, tg_ent_seeds))

    assert sr_seed_hid.shape == (n_seeds, dim)
    assert tg_seed_hid.shape == (n_seeds, dim)
    assert sr_ent_hid.shape == (ent_num_sr, dim)
    assert tg_ent_hid.shape == (ent_num_tg, dim)
    # rows are unit-norm after F.normalize-equivalent (normalize done in f32)
    assert jnp.allclose(jnp.linalg.norm(sr_ent_hid, axis=-1), 1.0, atol=1e-4)
    assert jnp.allclose(jnp.linalg.norm(tg_ent_hid, axis=-1), 1.0, atol=1e-4)
    # in-kernel seed gather is bit-exact with gathering the stored hidden states
    assert jnp.allclose(sr_seed_hid, sr_ent_hid[sr_ent_seeds], atol=0.0)
    assert jnp.allclose(tg_seed_hid, tg_ent_hid[tg_ent_seeds], atol=0.0)

    print("KERNEL_OK")
</pallas_src>

<mosaic_0001>
module attributes {stable_mosaic.version = 11 : i64} {
  func.func @_fused_gcn_kernel(%arg0: i32, %arg1: memref<2x8xi32, #tpu.memory_space<smem>>, %arg2: memref<1x256x256xbf16, #tpu.memory_space<vmem>>, %arg3: memref<1x256x128xbf16, #tpu.memory_space<vmem>>, %arg4: memref<128x128xbf16, #tpu.memory_space<vmem>>, %arg5: memref<1x256x128xf32, #tpu.memory_space<vmem>>, %arg6: memref<1x8x128xf32, #tpu.memory_space<vmem>>) attributes {dimension_semantics = [#tpu.dimension_semantics<parallel>], iteration_bounds = array<i64: 2>, scalar_prefetch = 1 : i64, scratch_operands = 0 : i64, tpu.core_type = #tpu.core_type<tc>, window_params = [{transform_indices = @transform_0, window_bounds = array<i64: 1, 256, 256>}, {transform_indices = @transform_1, window_bounds = array<i64: 1, 256, 128>}, {pipeline_mode = #tpu.pipeline_mode<synchronous>, transform_indices = @transform_2, window_bounds = array<i64: 128, 128>}, {transform_indices = @transform_3, window_bounds = array<i64: 1, 256, 128>}, {transform_indices = @transform_4, window_bounds = array<i64: 1, 8, 128>}]} {
    %c0 = arith.constant 0 : index
    %c0_0 = arith.constant 0 : index
    %c0_1 = arith.constant 0 : index
    %0 = vector.load %arg2[%c0, %c0_0, %c0_1] : memref<1x256x256xbf16, #tpu.memory_space<vmem>>, vector<1x256x256xbf16>
    %1 = vector.shape_cast %0 : vector<1x256x256xbf16> to vector<256x256xbf16>
    %c0_2 = arith.constant 0 : index
    %c0_3 = arith.constant 0 : index
    %c0_4 = arith.constant 0 : index
    %2 = vector.load %arg3[%c0_2, %c0_3, %c0_4] : memref<1x256x128xbf16, #tpu.memory_space<vmem>>, vector<1x256x128xbf16>
    %3 = vector.shape_cast %2 : vector<1x256x128xbf16> to vector<256x128xbf16>
    %cst = arith.constant dense<0.000000e+00> : vector<256x128xf32>
    %4 = tpu.matmul %1, %3, %cst {dimension_numbers = #tpu.dot_dimension_numbers<[1], [0], [0], [1], [0, 0, 1, 1], [], []>} : vector<256x256xbf16>, vector<256x128xbf16>, vector<256x128xf32> -> vector<256x128xf32>
    %cst_5 = arith.constant 0.000000e+00 : f32
    %5 = vector.broadcast %cst_5 : f32 to vector<256x128xf32>
    %6 = arith.maximumf %4, %5 : vector<256x128xf32>
    %7 = arith.truncf %6 : vector<256x128xf32> to vector<256x128xbf16>
    %c0_6 = arith.constant 0 : index
    %c0_7 = arith.constant 0 : index
    %8 = vector.load %arg4[%c0_6, %c0_7] : memref<128x128xbf16, #tpu.memory_space<vmem>>, vector<128x128xbf16>
    %cst_8 = arith.constant dense<0.000000e+00> : vector<256x128xf32>
    %9 = tpu.matmul %7, %8, %cst_8 {dimension_numbers = #tpu.dot_dimension_numbers<[1], [0], [0], [1], [0, 0, 1, 1], [], []>} : vector<256x128xbf16>, vector<128x128xbf16>, vector<256x128xf32> -> vector<256x128xf32>
    %c0_9 = arith.constant 0 : index
    %c0_10 = arith.constant 0 : index
    %c0_11 = arith.constant 0 : index
    %10 = vector.load %arg2[%c0_9, %c0_10, %c0_11] : memref<1x256x256xbf16, #tpu.memory_space<vmem>>, vector<1x256x256xbf16>
    %11 = vector.shape_cast %10 : vector<1x256x256xbf16> to vector<256x256xbf16>
    %12 = arith.truncf %9 : vector<256x128xf32> to vector<256x128xbf16>
    %cst_12 = arith.constant dense<0.000000e+00> : vector<256x128xf32>
    %13 = tpu.matmul %11, %12, %cst_12 {dimension_numbers = #tpu.dot_dimension_numbers<[1], [0], [0], [1], [0, 0, 1, 1], [], []>} : vector<256x256xbf16>, vector<256x128xbf16>, vector<256x128xf32> -> vector<256x128xf32>
    %14 = arith.mulf %13, %13 : vector<256x128xf32>
    %cst_13 = arith.constant dense<0.000000e+00> : vector<256xf32>
    %15 = vector.multi_reduction <add>, %14, %cst_13 [1] : vector<256x128xf32> to vector<256xf32>
    %16 = vector.shape_cast %15 : vector<256xf32> to vector<256x1xf32>
    %cst_14 = arith.constant 1.000000e-24 : f32
    %17 = vector.broadcast %cst_14 : f32 to vector<256x1xf32>
    %18 = arith.maximumf %16, %17 : vector<256x1xf32>
    %19 = math.rsqrt %18 : vector<256x1xf32>
    %20 = vector.broadcast %19 : vector<256x1xf32> to vector<256x128xf32>
    %21 = arith.mulf %13, %20 : vector<256x128xf32>
    %c0_15 = arith.constant 0 : index
    %c0_16 = arith.constant 0 : index
    %c0_17 = arith.constant 0 : index
    %22 = vector.load %arg5[%c0_15, %c0_16, %c0_17] : memref<1x256x128xf32, #tpu.memory_space<vmem>>, vector<1x256x128xf32>
    %23 = vector.shape_cast %22 : vector<1x256x128xf32> to vector<256x128xf32>
    %24 = vector.shape_cast %21 : vector<256x128xf32> to vector<1x256x128xf32>
    tpu.vector_store %arg5[%c0_15, %c0_16, %c0_17], %24 {strides = array<i32>} : memref<1x256x128xf32, #tpu.memory_space<vmem>>, vector<1x256x128xf32>,
    %25 = arith.index_cast %arg0 : i32 to index
    %c0_18 = arith.constant 0 : index
    %26 = memref.load %arg1[%25, %c0_18] : memref<2x8xi32, #tpu.memory_space<smem>>
    %c0_19 = arith.constant 0 : index
    %27 = arith.index_cast %26 : i32 to index
    %c0_20 = arith.constant 0 : index
    %28 = vector.load %arg5[%c0_19, %27, %c0_20] : memref<1x256x128xf32, #tpu.memory_space<vmem>>, vector<1x1x128xf32>
    %29 = vector.shape_cast %28 : vector<1x1x128xf32> to vector<1x128xf32>
    %c0_21 = arith.constant 0 : index
    %c0_22 = arith.constant 0 : index
    %c0_23 = arith.constant 0 : index
    %30 = vector.load %arg6[%c0_21, %c0_22, %c0_23] : memref<1x8x128xf32, #tpu.memory_space<vmem>>, vector<1x1x128xf32>
    %31 = vector.shape_cast %30 : vector<1x1x128xf32> to vector<1x128xf32>
    %32 = vector.shape_cast %29 : vector<1x128xf32> to vector<1x1x128xf32>
    tpu.vector_store %arg6[%c0_21, %c0_22, %c0_23], %32 {strides = array<i32>} : memref<1x8x128xf32, #tpu.memory_space<vmem>>, vector<1x1x128xf32>,
    %33 = arith.index_cast %arg0 : i32 to index
    %c1 = arith.constant 1 : index
    %34 = memref.load %arg1[%33, %c1] : memref<2x8xi32, #tpu.memory_space<smem>>
    %c0_24 = arith.constant 0 : index
    %35 = arith.index_cast %34 : i32 to index
    %c0_25 = arith.constant 0 : index
    %36 = vector.load %arg5[%c0_24, %35, %c0_25] : memref<1x256x128xf32, #tpu.memory_space<vmem>>, vector<1x1x128xf32>
    %37 = vector.shape_cast %36 : vector<1x1x128xf32> to vector<1x128xf32>
    %c0_26 = arith.constant 0 : index
    %c1_27 = arith.constant 1 : index
    %c0_28 = arith.constant 0 : index
    %38 = vector.load %arg6[%c0_26, %c1_27, %c0_28] : memref<1x8x128xf32, #tpu.memory_space<vmem>>, vector<1x1x128xf32>
    %39 = vector.shape_cast %38 : vector<1x1x128xf32> to vector<1x128xf32>
    %40 = vector.shape_cast %37 : vector<1x128xf32> to vector<1x1x128xf32>
    tpu.vector_store %arg6[%c0_26, %c1_27, %c0_28], %40 {strides = array<i32>} : memref<1x8x128xf32, #tpu.memory_space<vmem>>, vector<1x1x128xf32>,
    %41 = arith.index_cast %arg0 : i32 to index
    %c2 = arith.constant 2 : index
    %42 = memref.load %arg1[%41, %c2] : memref<2x8xi32, #tpu.memory_space<smem>>
    %c0_29 = arith.constant 0 : index
    %43 = arith.index_cast %42 : i32 to index
    %c0_30 = arith.constant 0 : index
    %44 = vector.load %arg5[%c0_29, %43, %c0_30] : memref<1x256x128xf32, #tpu.memory_space<vmem>>, vector<1x1x128xf32>
    %45 = vector.shape_cast %44 : vector<1x1x128xf32> to vector<1x128xf32>
    %c0_31 = arith.constant 0 : index
    %c2_32 = arith.constant 2 : index
    %c0_33 = arith.constant 0 : index
    %46 = vector.load %arg6[%c0_31, %c2_32, %c0_33] : memref<1x8x128xf32, #tpu.memory_space<vmem>>, vector<1x1x128xf32>
    %47 = vector.shape_cast %46 : vector<1x1x128xf32> to vector<1x128xf32>
    %48 = vector.shape_cast %45 : vector<1x128xf32> to vector<1x1x128xf32>
    tpu.vector_store %arg6[%c0_31, %c2_32, %c0_33], %48 {strides = array<i32>} : memref<1x8x128xf32, #tpu.memory_space<vmem>>, vector<1x1x128xf32>,
    %49 = arith.index_cast %arg0 : i32 to index
    %c3 = arith.constant 3 : index
    %50 = memref.load %arg1[%49, %c3] : memref<2x8xi32, #tpu.memory_space<smem>>
    %c0_34 = arith.constant 0 : index
    %51 = arith.index_cast %50 : i32 to index
    %c0_35 = arith.constant 0 : index
    %52 = vector.load %arg5[%c0_34, %51, %c0_35] : memref<1x256x128xf32, #tpu.memory_space<vmem>>, vector<1x1x128xf32>
    %53 = vector.shape_cast %52 : vector<1x1x128xf32> to vector<1x128xf32>
    %c0_36 = arith.constant 0 : index
    %c3_37 = arith.constant 3 : index
    %c0_38 = arith.constant 0 : index
    %54 = vector.load %arg6[%c0_36, %c3_37, %c0_38] : memref<1x8x128xf32, #tpu.memory_space<vmem>>, vector<1x1x128xf32>
    %55 = vector.shape_cast %54 : vector<1x1x128xf32> to vector<1x128xf32>
    %56 = vector.shape_cast %53 : vector<1x128xf32> to vector<1x1x128xf32>
    tpu.vector_store %arg6[%c0_36, %c3_37, %c0_38], %56 {strides = array<i32>} : memref<1x8x128xf32, #tpu.memory_space<vmem>>, vector<1x1x128xf32>,
    %57 = arith.index_cast %arg0 : i32 to index
    %c4 = arith.constant 4 : index
    %58 = memref.load %arg1[%57, %c4] : memref<2x8xi32, #tpu.memory_space<smem>>
    %c0_39 = arith.constant 0 : index
    %59 = arith.index_cast %58 : i32 to index
    %c0_40 = arith.constant 0 : index
    %60 = vector.load %arg5[%c0_39, %59, %c0_40] : memref<1x256x128xf32, #tpu.memory_space<vmem>>, vector<1x1x128xf32>
    %61 = vector.shape_cast %60 : vector<1x1x128xf32> to vector<1x128xf32>
    %c0_41 = arith.constant 0 : index
    %c4_42 = arith.constant 4 : index
    %c0_43 = arith.constant 0 : index
    %62 = vector.load %arg6[%c0_41, %c4_42, %c0_43] : memref<1x8x128xf32, #tpu.memory_space<vmem>>, vector<1x1x128xf32>
    %63 = vector.shape_cast %62 : vector<1x1x128xf32> to vector<1x128xf32>
    %64 = vector.shape_cast %61 : vector<1x128xf32> to vector<1x1x128xf32>
    tpu.vector_store %arg6[%c0_41, %c4_42, %c0_43], %64 {strides = array<i32>} : memref<1x8x128xf32, #tpu.memory_space<vmem>>, vector<1x1x128xf32>,
    %65 = arith.index_cast %arg0 : i32 to index
    %c5 = arith.constant 5 : index
    %66 = memref.load %arg1[%65, %c5] : memref<2x8xi32, #tpu.memory_space<smem>>
    %c0_44 = arith.constant 0 : index
    %67 = arith.index_cast %66 : i32 to index
    %c0_45 = arith.constant 0 : index
    %68 = vector.load %arg5[%c0_44, %67, %c0_45] : memref<1x256x128xf32, #tpu.memory_space<vmem>>, vector<1x1x128xf32>
    %69 = vector.shape_cast %68 : vector<1x1x128xf32> to vector<1x128xf32>
    %c0_46 = arith.constant 0 : index
    %c5_47 = arith.constant 5 : index
    %c0_48 = arith.constant 0 : index
    %70 = vector.load %arg6[%c0_46, %c5_47, %c0_48] : memref<1x8x128xf32, #tpu.memory_space<vmem>>, vector<1x1x128xf32>
    %71 = vector.shape_cast %70 : vector<1x1x128xf32> to vector<1x128xf32>
    %72 = vector.shape_cast %69 : vector<1x128xf32> to vector<1x1x128xf32>
    tpu.vector_store %arg6[%c0_46, %c5_47, %c0_48], %72 {strides = array<i32>} : memref<1x8x128xf32, #tpu.memory_space<vmem>>, vector<1x1x128xf32>,
    %73 = arith.index_cast %arg0 : i32 to index
    %c6 = arith.constant 6 : index
    %74 = memref.load %arg1[%73, %c6] : memref<2x8xi32, #tpu.memory_space<smem>>
    %c0_49 = arith.constant 0 : index
    %75 = arith.index_cast %74 : i32 to index
    %c0_50 = arith.constant 0 : index
    %76 = vector.load %arg5[%c0_49, %75, %c0_50] : memref<1x256x128xf32, #tpu.memory_space<vmem>>, vector<1x1x128xf32>
    %77 = vector.shape_cast %76 : vector<1x1x128xf32> to vector<1x128xf32>
    %c0_51 = arith.constant 0 : index
    %c6_52 = arith.constant 6 : index
    %c0_53 = arith.constant 0 : index
    %78 = vector.load %arg6[%c0_51, %c6_52, %c0_53] : memref<1x8x128xf32, #tpu.memory_space<vmem>>, vector<1x1x128xf32>
    %79 = vector.shape_cast %78 : vector<1x1x128xf32> to vector<1x128xf32>
    %80 = vector.shape_cast %77 : vector<1x128xf32> to vector<1x1x128xf32>
    tpu.vector_store %arg6[%c0_51, %c6_52, %c0_53], %80 {strides = array<i32>} : memref<1x8x128xf32, #tpu.memory_space<vmem>>, vector<1x1x128xf32>,
    %81 = arith.index_cast %arg0 : i32 to index
    %c7 = arith.constant 7 : index
    %82 = memref.load %arg1[%81, %c7] : memref<2x8xi32, #tpu.memory_space<smem>>
    %c0_54 = arith.constant 0 : index
    %83 = arith.index_cast %82 : i32 to index
    %c0_55 = arith.constant 0 : index
    %84 = vector.load %arg5[%c0_54, %83, %c0_55] : memref<1x256x128xf32, #tpu.memory_space<vmem>>, vector<1x1x128xf32>
    %85 = vector.shape_cast %84 : vector<1x1x128xf32> to vector<1x128xf32>
    %c0_56 = arith.constant 0 : index
    %c7_57 = arith.constant 7 : index
    %c0_58 = arith.constant 0 : index
    %86 = vector.load %arg6[%c0_56, %c7_57, %c0_58] : memref<1x8x128xf32, #tpu.memory_space<vmem>>, vector<1x1x128xf32>
    %87 = vector.shape_cast %86 : vector<1x1x128xf32> to vector<1x128xf32>
    %88 = vector.shape_cast %85 : vector<1x128xf32> to vector<1x1x128xf32>
    tpu.vector_store %arg6[%c0_56, %c7_57, %c0_58], %88 {strides = array<i32>} : memref<1x8x128xf32, #tpu.memory_space<vmem>>, vector<1x1x128xf32>,
    return
  }
  func.func @transform_0(%arg0: i32, %arg1: memref<2x8xi32, #tpu.memory_space<smem>>) -> (i32, i32, i32) {
    %c0_i32 = arith.constant 0 : i32
    %c0_i32_0 = arith.constant 0 : i32
    %c0_i32_1 = arith.constant 0 : i32
    return %arg0, %c0_i32, %c0_i32_0 : i32, i32, i32
  }
  func.func @transform_1(%arg0: i32, %arg1: memref<2x8xi32, #tpu.memory_space<smem>>) -> (i32, i32, i32) {
    %c0_i32 = arith.constant 0 : i32
    %c0_i32_0 = arith.constant 0 : i32
    %c0_i32_1 = arith.constant 0 : i32
    return %arg0, %c0_i32, %c0_i32_0 : i32, i32, i32
  }
  func.func @transform_2(%arg0: i32, %arg1: memref<2x8xi32, #tpu.memory_space<smem>>) -> (i32, i32) {
    %c0_i32 = arith.constant 0 : i32
    %c0_i32_0 = arith.constant 0 : i32
    %c0_i32_1 = arith.constant 0 : i32
    return %c0_i32, %c0_i32_0 : i32, i32
  }
  func.func @transform_3(%arg0: i32, %arg1: memref<2x8xi32, #tpu.memory_space<smem>>) -> (i32, i32, i32) {
    %c0_i32 = arith.constant 0 : i32
    %c0_i32_0 = arith.constant 0 : i32
    %c0_i32_1 = arith.constant 0 : i32
    return %arg0, %c0_i32, %c0_i32_0 : i32, i32, i32
  }
  func.func @transform_4(%arg0: i32, %arg1: memref<2x8xi32, #tpu.memory_space<smem>>) -> (i32, i32, i32) {
    %c0_i32 = arith.constant 0 : i32
    %c0_i32_0 = arith.constant 0 : i32
    %c0_i32_1 = arith.constant 0 : i32
    return %arg0, %c0_i32, %c0_i32_0 : i32, i32, i32
  }
}

</mosaic_0001>

<bundles_post_ra>
// kernel: tpu_custom_call.1
= control target key start
LH: loop header
LB: loop body
LE: loop exit
PB: predicated region body
PF: predicated region fallthrough
CT: control target
= control target key end

     0   :  { %s3233_s0 = inlined_call_operand.hbm [shape: s32[2,8], index: 0, kind: input, shape index: {}]   ;;  %s3234_s1 = inlined_call_operand.hbm [shape: bf16[2,256,256], index: 1, kind: input, shape index: {}]   ;;  %s3235_s2 = inlined_call_operand.hbm [shape: bf16[2,256,128], index: 2, kind: input, shape index: {}]   ;;  %s3236_s3 = inlined_call_operand.hbm [shape: bf16[128,128], index: 3, kind: input, shape index: {}]   ;;  %s3237_s4 = inlined_call_operand.hbm [shape: f32[2,256,128], index: 4, kind: output, shape index: {0}]   ;;  %s3238_s5 = inlined_call_operand.hbm [shape: f32[2,8,128], index: 5, kind: output, shape index: {1}]  }
   0x1   :  { %3249 = sst [smem:[#allocation24_spill]] %s3234_s1  ;;  %s2264_s20 = scalar_lea.hbm %s3233_s0, 32 }
   0x2   :  { %3250 = sst [smem:[#allocation25_spill]] %s3235_s2  ;;  %p2265_p0 = scmp.ne.s32.totalorder %s3233_s0, %s2264_s20 }
   0x3   :  { %3251 = sst [smem:[#allocation26_spill]] %s3236_s3  ;;  %p2268_p1 = scmp.lt.u32.totalorder %s2264_s20, %s3233_s0 }
   0x4   :  { %3252 = sst [smem:[#allocation27_spill]] %s3237_s4 }
   0x5   :  { %p2270_p2 = pnand %p2268_p1, %p2265_p0 }
   0x7   :  { %2273 = shalt.err (!%p2270_p2)  }
   0x8   :  { %s2472_s25 = smov [#allocation3]  }
   0x9   :  { %12 = dma.hbm_to_smem %s3233_s0, 32, %s2472_s25, [#allocation2] }
   0xa   :  { %2434 = dma.done.wait [#allocation2], 32 }
   0xb   :  { %2435 = vsyncadd [#allocation2], 4294967264 }
   0xc   :  { %14 = sfence }
   0xd   :  { %15 = vsyncpa [#allocation5], 0 }
   0xe   :  { %17 = vsyncpa [#allocation5 + $0x1], 0 }
   0xf   :  { %18 = vsyncpa [#allocation8], 0 }
  0x10   :  { %20 = vsyncpa [#allocation8 + $0x1], 0 }
  0x11   :  { %21 = vsyncpa [#allocation6], 0 }
  0x12   :  { %23 = vsyncpa [#allocation6 + $0x1], 0 }
  0x13   :  { %24 = vsyncpa [#allocation12], 0 }
  0x14   :  { %26 = vsyncpa [#allocation12 + $0x1], 0  ;;  %s2526_s28 = smov 0   ;;  %s2528_s29 = smov 0  }
  0x15   :  { %s2530_s30 = smov 0   ;;  %s2532_s6 = smov 0  }
  0x16 LB: > { %3253 = sst [smem:[#allocation19_spill]] %s2462_s29  ;;  %s2547_s0 = sadd.s32 4294967295, %s2470_s6   ;;  %s2470_s6 = sphi %s2532_s6, %s3280_s6   ;;  %s2466_s30 = sphi %s2530_s30, %s3283_s30   ;;  %s2462_s29 = sphi %s2528_s29, %s3282_s29   ;;  %s2458_s28 = sphi %s2526_s28, %s3281_s28  }
  0x17   : > { %3254 = sst [smem:[#allocation20_spill]] %s2466_s30  ;;  %s1659_s7 = sadd.s32 4294967294, %s2470_s6  }
  0x18   : > { %3255 = sst [smem:[#allocation21_spill]] %s2470_s6  ;;  %p52_p3 = scmp.ne.s32.totalorder %s2462_s29, %s2458_s28 }
  0x19   : > { %p3239_p4 = scmp.eq.s32.totalorder %s2547_s0, 0  ;;  %p129_p6 = scmp.eq.s32.totalorder %s1659_s7, 1 }
  0x1a   : > { %p1660_p8 = scmp.ge.s32.totalorder %s2470_s6, 1  ;;  %p162_p10 = scmp.lt.s32.totalorder %s2470_s6, 3 }
  0x1b   : > { %p2556_p7 = por %p3239_p4, %p52_p3  ;;  %p2561_p9 = por %p129_p6, %p52_p3 }
  0x1c   : > { %p2566_p11 = pnand %p1660_p8, %p162_p10  ;;  %s2473_s11 = smov [#allocation9]  }
  0x1d   : > { %s3256_s8 = scalar_select %p2556_p7, 1, 0 }
  0x1e   : > { %s3257_s9 = scalar_select %p2561_p9, 1, 0 }
  0x1f   : > { %s3258_s10 = scalar_select %p2566_p11, 1, 0 }
  0x20   : > { %s174_s12 = sshll.u32 %s2473_s11, 4  ;;  %p2066_p12 = pneg %p2566_p11  ;;  %s2570_s12 = int_to_ptr.vmem [resolvable:$true] %s174_s12 }
  0x21   : > { %s2582_s14 = sadd.s32 1, %s2470_s6   ;;  %s39_s15 = sadd.s32 1, %s2466_s30 }
  0x22   : > { %p2577_p0 = pnand %p2066_p12, %p3239_p4  ;;  %3260 = sst [smem:[#allocation22_spill]] %s2582_s14 }
  0x23   : > { %s36_s16 = ssub.s32 %s2470_s6, %s2582_s14  ;;  %s3261_s3 = sld [smem:[#allocation26_spill]] }
  0x24   : > { %p2276_p2 = pneg %p2577_p0 }
  0x29   : > { %s2274_s19 = scalar_lea.hbm %s3261_s3, 1024 }
  0x2a   : > { %p2275_p1 = scmp.ne.s32.totalorder %s3261_s3, %s2274_s19  ;;  %p2281_p8 = scmp.lt.u32.totalorder %s2274_s19, %s3261_s3 }
  0x2c   : > { %p2277_p3 = pnand %p2276_p2, %p2275_p1 }
  0x2e   : > { %p2278_p6 = pneg %p2277_p3 }
  0x30   : > { %p2283_p10 = pnand %p2281_p8, %p2278_p6 }
  0x32   : > { %2286 = shalt.err (!%p2283_p10)
}
  0x33   : > { %s2287_s24 = scalar_lea.vmem %s2570_s12, 1024  ;;  %p2295_p5 = scmp.lt.s32.totalorder %s2570_s12, %s2570_s12 }
  0x34   : > { %p2288_p12 = scmp.ne.s32.totalorder %s2570_s12, %s2287_s24  ;;  %p2296_p9 = scmp.lt.s32.totalorder %s2287_s24, %s2287_s24 }
  0x36   : > { %p2290_p13 = pnand %p2288_p12, %p2276_p2  ;;  %p2297_p7 = por %p2296_p9, %p2295_p5 }
  0x38   : > { %p2291_p4 = pneg %p2290_p13 }
  0x3a   : > { %p2298_p11 = pnand %p2297_p7, %p2291_p4 }
  0x3c   : > { %2301 = shalt.err (!%p2298_p11)
}
  0x3d   : > { %s3242_s25 = smov 64   ;;  %s3243_s26 = smov 4  }
  0x3e   : > { %2069 = dma.hbm_to_vmem [thread:$0]  (!%p2577_p0), %s3261_s3, 1024, %s2570_s12, [#allocation8], %s3242_s25, %s3242_s25, %s3243_s26  }
  0x3f   : > { %p37_p4 = scmp.eq.s32.totalorder %s36_s16, 0  ;;  %p46_p5 = scmp.ne.s32.totalorder %s2466_s30, %s2462_s29 }
  0x40   : > { %p47_p7 = scmp.eq.s32.totalorder %s2470_s6, 0  ;;  %p2085_p9 = scmp.lt.s32.totalorder %s2470_s6, 2 }
  0x41   : > { %s2616_s11 = scalar_select %p37_p4, %s2466_s30, %s39_s15  }
  0x42   : > { %p48_p11 = por %p47_p7, %p46_p5  ;;  %p3263_p13 = scmp.eq.s32.totalorder %s2547_s0, 1 }
  0x43   : > { %3262 = sst [smem:[#allocation23_spill]] %s2616_s11  ;;  %s2625_s13 = sand.u32 1, %s2466_s30  }
  0x44   : > { %p2620_p1 = por %p3263_p13, %p46_p5  ;;  %s1739_s18 = sshll.u32 %s2470_s6, 12 }
  0x45   : > { %s1663_s19 = sshll.u32 %s2625_s13, 8  ;;  %s3265_s1 = sld [smem:[#allocation24_spill]] }
  0x46   : > { %s192_s15 = scalar_lea.vmem [#allocation4], %s1663_s19  ;;  %p2634_p0 = pnand %p2085_p9, %p48_p11 }
  0x47   : > { %s199_s21 = sshll.u32 %s192_s15, 4  ;;  %s189_s23 = scalar_lea.sflag [#allocation5], %s2625_s13  ;;  %s2638_s21 = int_to_ptr.vmem [resolvable:$true] %s199_s21 }
  0x48   : > { %p2304_p3 = pneg %p2634_p0 }
  0x4b   : > { %s2632_s16 = scalar_lea.hbm %s3265_s1, %s1739_s18  ;;  %s2307_s18 = scalar_lea.hbm %s3265_s1, 8192 }
  0x4c   : > { %s2302_s24 = scalar_lea.hbm %s2632_s16, 4096  ;;  %p2308_p10 = scmp.lt.u32.totalorder %s2632_s16, %s3265_s1 }
  0x4d   : > { %p2303_p2 = scmp.ne.s32.totalorder %s2632_s16, %s2302_s24  ;;  %p2309_p12 = scmp.lt.u32.totalorder %s2307_s18, %s2302_s24 }
  0x4e   : > { %p2311_p5 = scmp.lt.u32.totalorder %s2302_s24, %s2632_s16 }
  0x4f   : > { %p2305_p6 = pnand %p2304_p3, %p2303_p2  ;;  %p2310_p4 = por %p2309_p12, %p2308_p10 }
  0x51   : > { %p2306_p8 = pneg %p2305_p6  ;;  %p2312_p7 = por %p2311_p5, %p2310_p4 }
  0x53   : > { %p2313_p9 = pnand %p2312_p7, %p2306_p8 }
  0x55   : > { %2316 = shalt.err (!%p2313_p9)
}
  0x56   : > { %s2317_s12 = scalar_lea.vmem %s2638_s21, 4096  ;;  %s2476_s15 = smov [#allocation4]  }
  0x57   : > { %p2318_p11 = scmp.ne.s32.totalorder %s2638_s21, %s2317_s12  ;;  %s2322_s27 = sshll.u32 %s2476_s15, 4  ;;  %s2323_s27 = int_to_ptr.vmem [resolvable:$false] %s2322_s27 }
  0x58   : > { %s2324_s7 = scalar_lea.vmem %s2323_s27, 8192  ;;  %p2325_p6 = scmp.lt.s32.totalorder %s2638_s21, %s2323_s27 }
  0x59   : > { %p2320_p13 = pnand %p2318_p11, %p2304_p3  ;;  %p2326_p10 = scmp.lt.s32.totalorder %s2324_s7, %s2317_s12 }
  0x5b   : > { %p2321_p2 = pneg %p2320_p13  ;;  %p2327_p12 = por %p2326_p10, %p2325_p6 }
  0x5d   : > { %p2328_p4 = pnand %p2327_p12, %p2321_p2 }
  0x5f   : > { %2331 = shalt.err (!%p2328_p4)
}
  0x60   : > { %s2477_s24 = smov 128   ;;  %s2478_s18 = smov 8  }
  0x61   : > { %2073 = dma.hbm_to_vmem [thread:$0]  (!%p2634_p0), %s2632_s16, 4096, %s2638_s21, %s189_s23, %s2477_s24, %s2477_s24, %s2478_s18  }
  0x62   : > { %s209_s19 = sand.u32 1, %s2470_s6   ;;  %s1666_s20 = sshll.u32 %s2625_s13, 7 }
  0x63   : > { %s1740_s15 = sshll.u32 %s2470_s6, 11  ;;  %s213_s12 = scalar_lea.vmem [#allocation7], %s1666_s20 }
  0x64   : > { %s220_s27 = sshll.u32 %s213_s12, 4  ;;  %s3267_s2 = sld [smem:[#allocation25_spill]]  ;;  %s2676_s27 = int_to_ptr.vmem [resolvable:$true] %s220_s27 }
  0x65   : > { %s2678_s1 = scalar_lea.sflag [#allocation8], %s209_s19 }
  0x6a   : > { %s2674_s26 = scalar_lea.hbm %s3267_s2, %s1740_s15  ;;  %s2337_s25 = scalar_lea.hbm %s3267_s2, 4096 }
  0x6b   : > { %s2332_s3 = scalar_lea.hbm %s2674_s26, 2048  ;;  %p2338_p9 = scmp.lt.u32.totalorder %s2674_s26, %s3267_s2 }
  0x6c   : > { %p2333_p8 = scmp.ne.s32.totalorder %s2674_s26, %s2332_s3  ;;  %p2339_p11 = scmp.lt.u32.totalorder %s2337_s25, %s2332_s3 }
  0x6d   : > { %p2341_p2 = scmp.lt.u32.totalorder %s2332_s3, %s2674_s26 }
  0x6e   : > { %p2335_p5 = pnand %p2333_p8, %p2304_p3  ;;  %p2340_p13 = por %p2339_p11, %p2338_p9 }
  0x70   : > { %p2336_p7 = pneg %p2335_p5  ;;  %p2342_p6 = por %p2341_p2, %p2340_p13 }
  0x72   : > { %p2343_p10 = pnand %p2342_p6, %p2336_p7 }
  0x74   : > { %2346 = shalt.err (!%p2343_p10)
}
  0x75   : > { %s2347_s24 = scalar_lea.vmem %s2676_s27, 2048  ;;  %s2479_s18 = smov [#allocation7]  }
  0x76   : > { %p2348_p12 = scmp.ne.s32.totalorder %s2676_s27, %s2347_s24  ;;  %s2352_s19 = sshll.u32 %s2479_s18, 4  ;;  %s2353_s19 = int_to_ptr.vmem [resolvable:$false] %s2352_s19 }
  0x77   : > { %s2354_s20 = scalar_lea.vmem %s2353_s19, 4096  ;;  %p2355_p5 = scmp.lt.s32.totalorder %s2676_s27, %s2353_s19 }
  0x78   : > { %p2350_p4 = pnand %p2348_p12, %p2304_p3  ;;  %p2356_p9 = scmp.lt.s32.totalorder %s2354_s20, %s2347_s24 }
  0x7a   : > { %p2351_p8 = pneg %p2350_p4  ;;  %p2357_p11 = por %p2356_p9, %p2355_p5 }
  0x7c   : > { %p2358_p13 = pnand %p2357_p11, %p2351_p8 }
  0x7e   : > { %2361 = shalt.err (!%p2358_p13)
}
  0x7f   : > { %s3268_s3 = smov 4   ;;  %s3269_s15 = smov 64  }
  0x80   : > { %2076 = dma.hbm_to_vmem [thread:$0]  (!%p2634_p0), %s2674_s26, 2048, %s2676_s27, %s2678_s1, %s3269_s15, %s3269_s15, %s3268_s3  }
  0x81   : > { %p3270_p3 = scmp.ne.s32.totalorder %s3258_s10, 0 }
  0x82   : > { %s2710_s12 = sand.u32 (!%p3270_p3), 1, %s2462_s29   ;;  %p3271_p7 = scmp.ne.s32.totalorder (!%p3270_p3), %s3256_s8, 0 }
  0x83   : > { %232 = sbr.rel (%p3270_p3) target bundleno = 1286 (0x506), region = 32  ;;  %s1670_s7 = sshll.u32 (!%p3270_p3), %s2710_s12, 8 }
  0x84   : > { %s235_s13 = scalar_lea.sflag (!%p3270_p3), [#allocation5], %s2710_s12  ;;  %s2716_s22 = scalar_lea.vmem (!%p3270_p3), [#allocation4], %s1670_s7 }
  0x8a   : > { %2437 = dma.done.wait (%p3271_p7), %s235_s13, 4096  }
  0x8b   : > { %2439 = vsyncadd (%p3271_p7), %s235_s13, 4294963200  ;;  %s243_s1 = sand.u32 1, %s2547_s0   ;;  %s1671_s10 = sshll.u32 %s2710_s12, 7 }
  0x8c   : > { %s244_s26 = scalar_lea.sflag [#allocation8], %s243_s1  ;;  %s2724_s27 = scalar_lea.vmem [#allocation7], %s1671_s10 }
  0x8d   : > { %2441 = dma.done.wait (%p3271_p7), %s244_s26, 2048  }
  0x8e   : > { %2443 = vsyncadd (%p3271_p7), %s244_s26, 4294965248  ;;  %p3272_p0 = scmp.eq.s32.totalorder %s2547_s0, 0 }
  0x90   : > { %2445 = dma.done.wait (%p3272_p0), [#allocation8], 1024   ;;  %p3273_p2 = pmov %p3272_p0 }
  0x91   : > { %v2128_v0 = vld [vmem:[%s2724_s27 + $0x40] sm:$0xff]   ;;  %v2130_v2 = vld [vmem:[%s2724_s27 + $0x48] sm:$0xff]   ;;  %v2132_v4 = vld [vmem:[%s2724_s27 + $0x50] sm:$0xff]   ;;  %s3041_s8 = scalar_lea.vmem [#allocation10], %s1670_s7  ;;  %s3099_s16 = sshll.u32 %s2547_s0, 7 }
  0x92   : > { %2447 = vsyncadd (%p3273_p2), [#allocation8], 4294966272  ;;  %v2129_v1 = vld [vmem:[%s2724_s27] sm:$0xff]   ;;  %1742 = vmatprep.subr.bf16.mxu0 %v2128_v0  ;;  %v2131_v3 = vld [vmem:[%s2724_s27 + $0x8] sm:$0xff]   ;;  %s1741_s25 = sshll.u32 %s2547_s0, 12  ;;  %s1501_s21 = sshll.u32 %s3041_s8, 4  ;;  %s3113_s21 = int_to_ptr.vmem [resolvable:$true] %s1501_s21 }
  0x93   : > { %1743 = vmatpush3.bf16.msra.mxu0 %v2129_v1  ;;  %v2133_v5 = vld [vmem:[%s2724_s27 + $0x10] sm:$0xff]   ;;  %v2134_v6 = vld [vmem:[%s2724_s27 + $0x58] sm:$0xff]   ;;  %v2136_v8 = vld [vmem:[%s2724_s27 + $0x60] sm:$0xff]   ;;  %s1447_s23 = sadd.s32 1, %s3099_s16  ;;  %s1452_s24 = sadd.s32 2, %s3099_s16 }
  0x94   : > { %1744 = vmatprep.subr.bf16.mxu0 %v2130_v2  ;;  %v2135_v7 = vld [vmem:[%s2724_s27 + $0x18] sm:$0xff]   ;;  %v2137_v9 = vld [vmem:[%s2724_s27 + $0x20] sm:$0xff]   ;;  %v2138_v10 = vld [vmem:[%s2724_s27 + $0x68] sm:$0xff]   ;;  %s3274_s4 = sld [smem:[#allocation27_spill]]  ;;  %s1457_s15 = sadd.s32 3, %s3099_s16 }
  0x95   : > { %v2746_v11 = vld [vmem:[%s2716_s22 + $0x4] ss:$8 sps:$4 sm:$0xff]   ;;  %v2140_v13 = vld [vmem:[%s2724_s27 + $0x70] sm:$0xff]   ;;  %v2142_v15 = vld [vmem:[%s2724_s27 + $0x78] sm:$0xff]   ;;  %s3117_s0 = sld [smem:[#allocation3 + %s3099_s16]]  ;;  %s1462_s7 = sadd.s32 4, %s3099_s16 }
  0x96   : > { %v2139_v12 = vld [vmem:[%s2724_s27 + $0x28] sm:$0xff]   ;;  %639 = vmatprep.mubr.bf16.mxu0 %v2746_v11  ;;  %v2141_v14 = vld [vmem:[%s2724_s27 + $0x30] sm:$0xff]   ;;  %v2143_v16 = vld [vmem:[%s2724_s27 + $0x38] sm:$0xff]   ;;  %s3119_s3 = sld [smem:[#allocation3 + %s1447_s23]]  ;;  %s1472_s1 = sadd.s32 6, %s3099_s16 }
  0x97   : > { %1745 = vmatpush3.bf16.msra.mxu0 %v2131_v3  ;;  %v2755_v17 = vld [vmem:[%s2716_s22] ss:$8 sps:$4 sm:$0xff]   ;;  %v2758_v18 = vld [vmem:[%s2716_s22 + $0x14] ss:$8 sps:$4 sm:$0xff]   ;;  %v2763_v19 = vld [vmem:[%s2716_s22 + $0x10] ss:$8 sps:$4 sm:$0xff]  }
  0x98   : > { %1746 = vmatprep.subr.bf16.mxu0 %v2132_v4  ;;  %v2766_v20 = vld [vmem:[%s2716_s22 + $0x24] ss:$8 sps:$4 sm:$0xff]   ;;  %v2194_v23 = vld [vmem:[#allocation9 + $0x10] sm:$0xff]   ;;  %v2771_v24 = vld [vmem:[%s2716_s22 + $0x20] ss:$8 sps:$4 sm:$0xff]   ;;  %s3123_s13 = sld [smem:[#allocation3 + %s1452_s24]] }
  0x99   : > { %v2192_v21 = vld [vmem:[#allocation9] sm:$0xff]   ;;  %v2193_v22 = vld [vmem:[#allocation9 + $0x8] sm:$0xff]   ;;  %v2195_v25 = vld [vmem:[#allocation9 + $0x18] sm:$0xff]   ;;  %s1477_s10 = sadd.s32 7, %s3099_s16  ;;  %s3129_s26 = sld [smem:[#allocation3 + %s1457_s15]] }
  0x9a   : > { %2038 = vmatprep.subr.bf16.mxu1 %v2192_v21  ;;  %v2774_v26 = vld [vmem:[%s2716_s22 + $0x34] ss:$8 sps:$4 sm:$0xff]   ;;  %v2779_v27 = vld [vmem:[%s2716_s22 + $0x30] ss:$8 sps:$4 sm:$0xff]   ;;  %v2782_v28 = vld [vmem:[%s2716_s22 + $0x44] ss:$8 sps:$4 sm:$0xff]   ;;  %s3111_s20 = scalar_lea.hbm %s3274_s4, %s1741_s25 }
  0x9b   : > { %1747 = vmatpush3.bf16.msra.mxu0 %v2133_v5  ;;  %2046 = vmatpush3.bf16.msra.mxu1 %v2192_v21  ;;  %v2787_v29 = vld [vmem:[%s2716_s22 + $0x40] ss:$8 sps:$4 sm:$0xff]   ;;  %v2790_v30 = vld [vmem:[%s2716_s22 + $0x54] ss:$8 sps:$4 sm:$0xff]   ;;  %v2795_v31 = vld [vmem:[%s2716_s22 + $0x50] ss:$8 sps:$4 sm:$0xff]  }
  0x9c   : > { %1748 = vmatprep.subr.bf16.mxu0 %v2134_v6  ;;  %2039 = vmatprep.subr.bf16.mxu1 %v2193_v22  ;;  %v2798_v32 = vld [vmem:[%s2716_s22 + $0x64] ss:$8 sps:$4 sm:$0xff]   ;;  %v2803_v33 = vld [vmem:[%s2716_s22 + $0x60] ss:$8 sps:$4 sm:$0xff]   ;;  %v2806_v34 = vld [vmem:[%s2716_s22 + $0x74] ss:$8 sps:$4 sm:$0xff]  }
  0x9d   : > { %v2811_v35 = vld [vmem:[%s2716_s22 + $0x70] ss:$8 sps:$4 sm:$0xff]   ;;  %v2814_v36 = vld [vmem:[%s2716_s22 + $0x84] ss:$8 sps:$4 sm:$0xff]   ;;  %v2819_v37 = vld [vmem:[%s2716_s22 + $0x80] ss:$8 sps:$4 sm:$0xff]  }
  0x9e   : > { %v2822_v38 = vld [vmem:[%s2716_s22 + $0x94] ss:$8 sps:$4 sm:$0xff]   ;;  %v2827_v39 = vld [vmem:[%s2716_s22 + $0x90] ss:$8 sps:$4 sm:$0xff]   ;;  %v2830_v40 = vld [vmem:[%s2716_s22 + $0xa4] ss:$8 sps:$4 sm:$0xff]  }
  0x9f   : > { %1749 = vmatpush3.bf16.msra.mxu0 %v2135_v7  ;;  %2047 = vmatpush3.bf16.msra.mxu1 %v2193_v22  ;;  %v2835_v41 = vld [vmem:[%s2716_s22 + $0xa0] ss:$8 sps:$4 sm:$0xff]   ;;  %v2838_v42 = vld [vmem:[%s2716_s22 + $0xb4] ss:$8 sps:$4 sm:$0xff]   ;;  %v2843_v44 = vld [vmem:[%s2716_s22 + $0xb0] ss:$8 sps:$4 sm:$0xff]  }
  0xa0   : > { %1750 = vmatprep.subr.bf16.mxu0 %v2136_v8  ;;  %2040 = vmatprep.subr.bf16.mxu1 %v2194_v23  ;;  %v2196_v43 = vld [vmem:[#allocation9 + $0x20] sm:$0xff]   ;;  %v2197_v46 = vld [vmem:[#allocation9 + $0x28] sm:$0xff]   ;;  %v2198_v47 = vld [vmem:[#allocation9 + $0x30] sm:$0xff]   ;;  %s3131_s27 = sld [smem:[#allocation3 + %s1462_s7]]  ;;  %s2362_s2 = scalar_lea.vmem %s3113_s21, 4096 }
  0xa1   : > { %v2846_v45 = vld [vmem:[%s2716_s22 + $0xc4] ss:$8 sps:$4 sm:$0xff]   ;;  %v2851_v48 = vld [vmem:[%s2716_s22 + $0xc0] ss:$8 sps:$4 sm:$0xff]   ;;  %v2854_v49 = vld [vmem:[%s2716_s22 + $0xd4] ss:$8 sps:$4 sm:$0xff]   ;;  %p2363_p6 = scmp.ne.s32.totalorder %s3113_s21, %s2362_s2 }
  0xa2   : > { %v2199_v50 = vld [vmem:[#allocation9 + $0x38] sm:$0xff]   ;;  %v2862_v52 = vld [vmem:[%s2716_s22 + $0xe4] ss:$8 sps:$4 sm:$0xff]   ;;  %v2867_v53 = vld [vmem:[%s2716_s22 + $0xe0] ss:$8 sps:$4 sm:$0xff]   ;;  %s3138_s24 = sld [smem:[#allocation3 + %s1472_s1]] }
  0xa3   : > { %1751 = vmatpush3.bf16.msra.mxu0 %v2137_v9  ;;  %2048 = vmatpush3.bf16.msra.mxu1 %v2194_v23  ;;  %v2859_v51 = vld [vmem:[%s2716_s22 + $0xd0] ss:$8 sps:$4 sm:$0xff]   ;;  %v2870_v54 = vld [vmem:[%s2716_s22 + $0xf4] ss:$8 sps:$4 sm:$0xff]   ;;  %s3140_s18 = sld [smem:[#allocation3 + %s1477_s10]]  ;;  %p2364_p10 = pnand %p2363_p6, %p2620_p1 }
  0xa4   : > { %1752 = vmatprep.subr.bf16.mxu0 %v2138_v10  ;;  %2041 = vmatprep.subr.bf16.mxu1 %v2195_v25  ;;  %v2875_v55 = vld [vmem:[%s2716_s22 + $0xf0] ss:$8 sps:$4 sm:$0xff]   ;;  %s1467_s22 = sadd.s32 5, %s3099_s16  ;;  %s2480_s15 = smov [#allocation10]  }
  0xa5   : > { %s3134_s23 = sld [smem:[#allocation3 + %s1467_s22]]  ;;  %p2365_p12 = pneg %p2364_p10 }
  0xa6   : > { %s2366_s7 = sshll.u32 %s2480_s15, 4  ;;  %s2367_s7 = int_to_ptr.vmem [resolvable:$false] %s2366_s7 }
  0xa7   : > { %1753 = vmatpush3.bf16.msra.mxu0 %v2139_v12  ;;  %2049 = vmatpush3.bf16.msra.mxu1 %v2195_v25  ;;  %s2368_s25 = scalar_lea.vmem %s2367_s7, 8192  ;;  %p2369_p4 = scmp.lt.s32.totalorder %s3113_s21, %s2367_s7 }
  0xa8   : > { %1754 = vmatprep.subr.bf16.mxu0 %v2140_v13  ;;  %2042 = vmatprep.subr.bf16.mxu1 %v2196_v43  ;;  %p2370_p8 = scmp.lt.s32.totalorder %s2368_s25, %s2362_s2 }
  0xaa   : > { %p2371_p5 = por %p2370_p8, %p2369_p4 }
  0xab   : > { %1755 = vmatpush3.bf16.msra.mxu0 %v2141_v14  ;;  %2050 = vmatpush3.bf16.msra.mxu1 %v2196_v43 }
  0xac   : > { %1756 = vmatprep.subr.bf16.mxu0 %v2142_v15  ;;  %2043 = vmatprep.subr.bf16.mxu1 %v2197_v46  ;;  %p2372_p9 = pnand %p2371_p5, %p2365_p12 }
  0xaf   : > { %1757 = vmatpush3.bf16.msra.mxu0 %v2143_v16  ;;  %2051 = vmatpush3.bf16.msra.mxu1 %v2197_v46 }
  0xb0   : > { %1990 = vmatprep.subr.bf16.mxu0 %v2192_v21  ;;  %2044 = vmatprep.subr.bf16.mxu1 %v2198_v47 }
  0xb2   : > { %640 = vmatmul.mubr.bf16.vlgmr.msra.gmra.mrb[0].mxu0 %v2755_v17 }
  0xb3   : > { %647 = vmatprep.mubr.bf16.mxu0 %v2758_v18  ;;  %1991 = vmatpush3.bf16.msra.mxu0 %v2192_v21 }
  0xb4   : > { %1992 = vmatprep.subr.bf16.mxu0 %v2193_v22  ;;  %2052 = vmatpush3.bf16.msra.mxu1 %v2198_v47 }
  0xb5   : > { %2045 = vmatprep.subr.bf16.mxu1 %v2199_v50 }
  0xb7   : > { %1993 = vmatpush3.bf16.msra.mxu0 %v2193_v22 }
  0xb8   : > { %1994 = vmatprep.subr.bf16.mxu0 %v2194_v23  ;;  %2053 = vmatpush3.bf16.msra.mxu1 %v2199_v50 }
  0xba   : > { %648 = vmatmul.mubr.bf16.gmra.mrb[4].mxu0 %v2763_v19 }
  0xbb   : > { %655 = vmatprep.mubr.bf16.mxu0 %v2766_v20  ;;  %1995 = vmatpush3.bf16.msra.mxu0 %v2194_v23 }
  0xbc   : > { %1996 = vmatprep.subr.bf16.mxu0 %v2195_v25 }
  0xbf   : > { %1997 = vmatpush3.bf16.msra.mxu0 %v2195_v25 }
  0xc0   : > { %1998 = vmatprep.subr.bf16.mxu0 %v2196_v43 }
  0xc2   : > { %656 = vmatmul.mubr.bf16.gmra.mrb[8].mxu0 %v2771_v24 }
  0xc3   : > { %663 = vmatprep.mubr.bf16.mxu0 %v2774_v26  ;;  %1999 = vmatpush3.bf16.msra.mxu0 %v2196_v43 }
  0xc4   : > { %2000 = vmatprep.subr.bf16.mxu0 %v2197_v46 }
  0xc7   : > { %2001 = vmatpush3.bf16.msra.mxu0 %v2197_v46 }
  0xc8   : > { %2002 = vmatprep.subr.bf16.mxu0 %v2198_v47 }
  0xca   : > { %664 = vmatmul.mubr.bf16.gmra.mrb[12].mxu0 %v2779_v27 }
  0xcb   : > { %671 = vmatprep.mubr.bf16.mxu0 %v2782_v28  ;;  %2003 = vmatpush3.bf16.msra.mxu0 %v2198_v47 }
  0xcc   : > { %2004 = vmatprep.subr.bf16.mxu0 %v2199_v50 }
  0xcf   : > { %2005 = vmatpush3.bf16.msra.mxu0 %v2199_v50 }
  0xd2   : > { %672 = vmatmul.mubr.bf16.gmra.mrb[16].mxu0 %v2787_v29 }
  0xd3   : > { %679 = vmatprep.mubr.bf16.mxu0 %v2790_v30 }
  0xda   : > { %680 = vmatmul.mubr.bf16.gmra.mrb[20].mxu0 %v2795_v31 }
  0xdb   : > { %687 = vmatprep.mubr.bf16.mxu0 %v2798_v32 }
  0xe2   : > { %688 = vmatmul.mubr.bf16.gmra.mrb[24].mxu0 %v2803_v33 }
  0xe3   : > { %695 = vmatprep.mubr.bf16.mxu0 %v2806_v34 }
  0xea   : > { %696 = vmatmul.mubr.bf16.gmra.mrb[28].mxu0 %v2811_v35 }
  0xeb   : > { %703 = vmatprep.mubr.bf16.mxu0 %v2814_v36 }
  0xf2   : > { %704 = vmatmul.mubr.bf16.gmra.mrb[32].mxu0 %v2819_v37 }
  0xf3   : > { %711 = vmatprep.mubr.bf16.mxu0 %v2822_v38 }
  0xfa   : > { %712 = vmatmul.mubr.bf16.gmra.mrb[36].mxu0 %v2827_v39 }
  0xfb   : > { %719 = vmatprep.mubr.bf16.mxu0 %v2830_v40 }
 0x102   : > { %720 = vmatmul.mubr.bf16.gmra.mrb[40].mxu0 %v2835_v41 }
 0x103   : > { %727 = vmatprep.mubr.bf16.mxu0 %v2838_v42 }
 0x10a   : > { %728 = vmatmul.mubr.bf16.gmra.mrb[44].mxu0 %v2843_v44 }
 0x10b   : > { %735 = vmatprep.mubr.bf16.mxu0 %v2846_v45 }
 0x112   : > { %736 = vmatmul.mubr.bf16.gmra.mrb[48].mxu0 %v2851_v48 }
 0x113   : > { %743 = vmatprep.mubr.bf16.mxu0 %v2854_v49 }
 0x11a   : > { %744 = vmatmul.mubr.bf16.gmra.mrb[52].mxu0 %v2859_v51 }
 0x11b   : > { %751 = vmatprep.mubr.bf16.mxu0 %v2862_v52 }
 0x122   : > { %752 = vmatmul.mubr.bf16.gmra.mrb[56].mxu0 %v2867_v53 }
 0x123   : > { %759 = vmatprep.mubr.bf16.mxu0 %v2870_v54 }
 0x12a   : > { %760 = vmatmul.mubr.bf16.gmra.mrb[60].mxu0 %v2875_v55 }
 0x185   : > { %v1758_v56 = vpop.f32.mrb[0].mxu0 }
 0x186   : > { %v1759_v57 = vpop.f32.mrb[1].mxu0 }
 0x187   : > { %v1760_v58 = vadd.f32 %v1759_v57, %v1758_v56  ;;  %v1761_v59 = vpop.f32.mrb[2].mxu0 }
 0x188   : > { %v1762_v60 = vpop.f32.mrb[3].mxu0 }
 0x189   : > { %v1763_v61 = vadd.f32 %v1762_v60, %v1761_v59  ;;  %v768_v62 = vmax.f32 %v1760_v58, 0.0 }
 0x18b   : > { %v769_v63 = vmax.f32 %v1763_v61, 0.0 }
 0x18d   : > { %v800_v0 = vpack.c.bf16 %v769_v63, %v768_v62  ;;  %v1764_v1 = vpop.f32.mrb[4].mxu0 }
 0x18e   : > { %v1765_v2 = vpop.f32.mrb[5].mxu0 }
 0x18f   : > { %v1766_v3 = vadd.f32 %v1765_v2, %v1764_v1  ;;  %v1767_v4 = vpop.f32.mrb[6].mxu0  ;;  %2006 = vmatprep.mubr.bf16.mxu0 %v800_v0 }
 0x190   : > { %v1768_v5 = vpop.f32.mrb[7].mxu0 }
 0x191   : > { %v1769_v6 = vadd.f32 %v1768_v5, %v1767_v4  ;;  %v770_v7 = vmax.f32 %v1766_v3, 0.0 }
 0x193   : > { %v771_v8 = vmax.f32 %v1769_v6, 0.0 }
 0x195   : > { %v801_v9 = vpack.c.bf16 %v771_v8, %v770_v7  ;;  %v1770_v10 = vpop.f32.mrb[8].mxu0 }
 0x196   : > { %v1771_v12 = vpop.f32.mrb[9].mxu0 }
 0x197   : > { %v1772_v13 = vadd.f32 %v1771_v12, %v1770_v10  ;;  %v1773_v14 = vpop.f32.mrb[10].mxu0  ;;  %2007 = vmatmul.mubr.bf16.vlgmr.msra.gmra.mrb[64].mxu0 %v801_v9 }
 0x198   : > { %v1774_v15 = vpop.f32.mrb[11].mxu0 }
 0x199   : > { %v1775_v16 = vadd.f32 %v1774_v15, %v1773_v14  ;;  %v772_v21 = vmax.f32 %v1772_v13, 0.0 }
 0x19b   : > { %v773_v22 = vmax.f32 %v1775_v16, 0.0 }
 0x19d   : > { %v802_v23 = vpack.c.bf16 %v773_v22, %v772_v21  ;;  %v1776_v25 = vpop.f32.mrb[12].mxu0 }
 0x19e   : > { %v1777_v43 = vpop.f32.mrb[13].mxu0 }
 0x19f   : > { %v1778_v46 = vadd.f32 %v1777_v43, %v1776_v25  ;;  %v1779_v47 = vpop.f32.mrb[14].mxu0  ;;  %2010 = vmatprep.mubr.bf16.mxu0 %v802_v23 }
 0x1a0   : > { %v1780_v50 = vpop.f32.mrb[15].mxu0 }
 0x1a1   : > { %v1781_v56 = vadd.f32 %v1780_v50, %v1779_v47  ;;  %v774_v57 = vmax.f32 %v1778_v46, 0.0 }
 0x1a3   : > { %v775_v58 = vmax.f32 %v1781_v56, 0.0 }
 0x1a5   : > { %v803_v59 = vpack.c.bf16 %v775_v58, %v774_v57  ;;  %v1782_v60 = vpop.f32.mrb[16].mxu0 }
 0x1a6   : > { %v1783_v61 = vpop.f32.mrb[17].mxu0 }
 0x1a7   : > { %v1784_v62 = vadd.f32 %v1783_v61, %v1782_v60  ;;  %v1785_v63 = vpop.f32.mrb[18].mxu0  ;;  %2011 = vmatmul.mubr.bf16.gmra.mrb[68].mxu0 %v803_v59 }
 0x1a8   : > { %v1786_v0 = vpop.f32.mrb[19].mxu0 }
 0x1a9   : > { %v1787_v1 = vadd.f32 %v1786_v0, %v1785_v63  ;;  %v776_v2 = vmax.f32 %v1784_v62, 0.0 }
 0x1ab   : > { %v777_v3 = vmax.f32 %v1787_v1, 0.0 }
 0x1ad   : > { %v804_v4 = vpack.c.bf16 %v777_v3, %v776_v2  ;;  %v1788_v5 = vpop.f32.mrb[20].mxu0 }
 0x1ae   : > { %v1789_v6 = vpop.f32.mrb[21].mxu0 }
 0x1af   : > { %v1790_v7 = vadd.f32 %v1789_v6, %v1788_v5  ;;  %v1791_v8 = vpop.f32.mrb[22].mxu0  ;;  %2014 = vmatprep.mubr.bf16.mxu0 %v804_v4 }
 0x1b0   : > { %v1792_v9 = vpop.f32.mrb[23].mxu0 }
 0x1b1   : > { %v1793_v10 = vadd.f32 %v1792_v9, %v1791_v8  ;;  %v778_v12 = vmax.f32 %v1790_v7, 0.0 }
 0x1b3   : > { %v779_v13 = vmax.f32 %v1793_v10, 0.0 }
 0x1b5   : > { %v805_v14 = vpack.c.bf16 %v779_v13, %v778_v12  ;;  %v1794_v15 = vpop.f32.mrb[24].mxu0 }
 0x1b6   : > { %v1795_v16 = vpop.f32.mrb[25].mxu0 }
 0x1b7   : > { %v1796_v21 = vadd.f32 %v1795_v16, %v1794_v15  ;;  %v1797_v22 = vpop.f32.mrb[26].mxu0  ;;  %2015 = vmatmul.mubr.bf16.gmra.mrb[72].mxu0 %v805_v14 }
 0x1b8   : > { %v1798_v23 = vpop.f32.mrb[27].mxu0 }
 0x1b9   : > { %v1799_v25 = vadd.f32 %v1798_v23, %v1797_v22  ;;  %v780_v43 = vmax.f32 %v1796_v21, 0.0 }
 0x1bb   : > { %v781_v46 = vmax.f32 %v1799_v25, 0.0 }
 0x1bd   : > { %v806_v47 = vpack.c.bf16 %v781_v46, %v780_v43  ;;  %v1800_v50 = vpop.f32.mrb[28].mxu0 }
 0x1be   : > { %v1801_v56 = vpop.f32.mrb[29].mxu0 }
 0x1bf   : > { %v1802_v57 = vadd.f32 %v1801_v56, %v1800_v50  ;;  %v1803_v58 = vpop.f32.mrb[30].mxu0  ;;  %2018 = vmatprep.mubr.bf16.mxu0 %v806_v47 }
 0x1c0   : > { %v1804_v59 = vpop.f32.mrb[31].mxu0 }
 0x1c1   : > { %v1805_v60 = vadd.f32 %v1804_v59, %v1803_v58  ;;  %v782_v61 = vmax.f32 %v1802_v57, 0.0 }
 0x1c3   : > { %v783_v62 = vmax.f32 %v1805_v60, 0.0 }
 0x1c5   : > { %v807_v63 = vpack.c.bf16 %v783_v62, %v782_v61  ;;  %v1806_v0 = vpop.f32.mrb[32].mxu0 }
 0x1c6   : > { %v1807_v1 = vpop.f32.mrb[33].mxu0 }
 0x1c7   : > { %v1808_v2 = vadd.f32 %v1807_v1, %v1806_v0  ;;  %v1809_v3 = vpop.f32.mrb[34].mxu0  ;;  %2019 = vmatmul.mubr.bf16.gmra.mrb[76].mxu0 %v807_v63 }
 0x1c8   : > { %v1810_v4 = vpop.f32.mrb[35].mxu0 }
 0x1c9   : > { %v1811_v5 = vadd.f32 %v1810_v4, %v1809_v3  ;;  %v784_v6 = vmax.f32 %v1808_v2, 0.0 }
 0x1cb   : > { %v785_v7 = vmax.f32 %v1811_v5, 0.0 }
 0x1cd   : > { %v1812_v8 = vpop.f32.mrb[36].mxu0  ;;  %v808_v9 = vpack.c.bf16 %v785_v7, %v784_v6 }
 0x1ce   : > { %v1813_v10 = vpop.f32.mrb[37].mxu0 }
 0x1cf   : > { %v1814_v12 = vadd.f32 %v1813_v10, %v1812_v8  ;;  %v1815_v13 = vpop.f32.mrb[38].mxu0  ;;  %2022 = vmatprep.mubr.bf16.mxu1 %v808_v9 }
 0x1d0   : > { %v1816_v14 = vpop.f32.mrb[39].mxu0 }
 0x1d1   : > { %v1817_v15 = vadd.f32 %v1816_v14, %v1815_v13  ;;  %v786_v16 = vmax.f32 %v1814_v12, 0.0 }
 0x1d3   : > { %v787_v21 = vmax.f32 %v1817_v15, 0.0 }
 0x1d5   : > { %v809_v22 = vpack.c.bf16 %v787_v21, %v786_v16  ;;  %v1818_v23 = vpop.f32.mrb[40].mxu0 }
 0x1d6   : > { %v1819_v25 = vpop.f32.mrb[41].mxu0 }
 0x1d7   : > { %v1820_v43 = vadd.f32 %v1819_v25, %v1818_v23  ;;  %v1821_v46 = vpop.f32.mrb[42].mxu0  ;;  %2023 = vmatmul.mubr.bf16.vlgmr.msra.gmra.mrb[0].mxu1 %v809_v22 }
 0x1d8   : > { %v1822_v47 = vpop.f32.mrb[43].mxu0 }
 0x1d9   : > { %v1823_v50 = vadd.f32 %v1822_v47, %v1821_v46  ;;  %v788_v56 = vmax.f32 %v1820_v43, 0.0 }
 0x1db   : > { %v789_v57 = vmax.f32 %v1823_v50, 0.0 }
 0x1dd   : > { %v810_v58 = vpack.c.bf16 %v789_v57, %v788_v56  ;;  %v1824_v59 = vpop.f32.mrb[44].mxu0 }
 0x1de   : > { %v1825_v60 = vpop.f32.mrb[45].mxu0 }
 0x1df   : > { %v1826_v61 = vadd.f32 %v1825_v60, %v1824_v59  ;;  %v1827_v62 = vpop.f32.mrb[46].mxu0  ;;  %2026 = vmatprep.mubr.bf16.mxu1 %v810_v58 }
 0x1e0   : > { %v1828_v63 = vpop.f32.mrb[47].mxu0 }
 0x1e1   : > { %v1829_v0 = vadd.f32 %v1828_v63, %v1827_v62  ;;  %v790_v1 = vmax.f32 %v1826_v61, 0.0 }
 0x1e3   : > { %v791_v2 = vmax.f32 %v1829_v0, 0.0 }
 0x1e5   : > { %v811_v3 = vpack.c.bf16 %v791_v2, %v790_v1  ;;  %v1830_v4 = vpop.f32.mrb[48].mxu0 }
 0x1e6   : > { %v1831_v5 = vpop.f32.mrb[49].mxu0 }
 0x1e7   : > { %v1832_v6 = vadd.f32 %v1831_v5, %v1830_v4  ;;  %v1833_v7 = vpop.f32.mrb[50].mxu0  ;;  %2027 = vmatmul.mubr.bf16.gmra.mrb[4].mxu1 %v811_v3 }
 0x1e8   : > { %v1834_v8 = vpop.f32.mrb[51].mxu0 }
 0x1e9   : > { %v1835_v9 = vadd.f32 %v1834_v8, %v1833_v7  ;;  %v792_v10 = vmax.f32 %v1832_v6, 0.0 }
 0x1eb   : > { %v793_v12 = vmax.f32 %v1835_v9, 0.0 }
 0x1ed   : > { %v812_v13 = vpack.c.bf16 %v793_v12, %v792_v10  ;;  %v1836_v14 = vpop.f32.mrb[52].mxu0 }
 0x1ee   : > { %v1837_v15 = vpop.f32.mrb[53].mxu0 }
 0x1ef   : > { %v1838_v16 = vadd.f32 %v1837_v15, %v1836_v14  ;;  %v1839_v21 = vpop.f32.mrb[54].mxu0  ;;  %2030 = vmatprep.mubr.bf16.mxu1 %v812_v13 }
 0x1f0   : > { %v1840_v22 = vpop.f32.mrb[55].mxu0 }
 0x1f1   : > { %v1841_v23 = vadd.f32 %v1840_v22, %v1839_v21  ;;  %v794_v25 = vmax.f32 %v1838_v16, 0.0 }
 0x1f3   : > { %v795_v43 = vmax.f32 %v1841_v23, 0.0 }
 0x1f5   : > { %v813_v46 = vpack.c.bf16 %v795_v43, %v794_v25  ;;  %v1842_v47 = vpop.f32.mrb[56].mxu0 }
 0x1f6   : > { %v1843_v50 = vpop.f32.mrb[57].mxu0 }
 0x1f7   : > { %v1844_v56 = vadd.f32 %v1843_v50, %v1842_v47  ;;  %v1845_v57 = vpop.f32.mrb[58].mxu0  ;;  %2031 = vmatmul.mubr.bf16.gmra.mrb[8].mxu1 %v813_v46 }
 0x1f8   : > { %v1846_v58 = vpop.f32.mrb[59].mxu0 }
 0x1f9   : > { %v1847_v59 = vadd.f32 %v1846_v58, %v1845_v57  ;;  %v796_v60 = vmax.f32 %v1844_v56, 0.0 }
 0x1fb   : > { %v797_v61 = vmax.f32 %v1847_v59, 0.0 }
 0x1fd   : > { %v814_v62 = vpack.c.bf16 %v797_v61, %v796_v60  ;;  %v1848_v63 = vpop.f32.mrb[60].mxu0 }
 0x1fe   : > { %v1849_v0 = vpop.f32.mrb[61].mxu0 }
 0x1ff   : > { %v1850_v1 = vadd.f32 %v1849_v0, %v1848_v63  ;;  %v1851_v2 = vpop.f32.mrb[62].mxu0  ;;  %2034 = vmatprep.mubr.bf16.mxu1 %v814_v62 }
 0x200   : > { %v1852_v3 = vpop.f32.mrb[63].mxu0 }
 0x201   : > { %v1853_v4 = vadd.f32 %v1852_v3, %v1851_v2  ;;  %v798_v5 = vmax.f32 %v1850_v1, 0.0 }
 0x203   : > { %v799_v6 = vmax.f32 %v1853_v4, 0.0 }
 0x205   : > { %v815_v7 = vpack.c.bf16 %v799_v6, %v798_v5 }
 0x207   : > { %2035 = vmatmul.mubr.bf16.gmra.mrb[12].mxu1 %v815_v7 }
 0x208   : > { %1089 = vmatprep.mubr.bf16.mxu1 %v2746_v11 }
 0x26a   : > { %v2008_v8 = vpop.f32.mrb[64].mxu0 }
 0x26b   : > { %v914_v9 = vpop.f32.mrb[65].mxu0 }
 0x26c   : > { %v2009_v10 = vpop.f32.mrb[66].mxu0 }
 0x26d   : > { %v1042_v12 = vpack.c.bf16 %v2009_v10, %v2008_v8  ;;  %v917_v13 = vpop.f32.mrb[67].mxu0 }
 0x26e   : > { %v1041_v14 = vpack.c.bf16 %v917_v13, %v914_v9 }
 0x27a   : > { %v2012_v15 = vpop.f32.mrb[68].mxu0 }
 0x27b   : > { %v930_v16 = vpop.f32.mrb[69].mxu0 }
 0x27c   : > { %v2013_v21 = vpop.f32.mrb[70].mxu0 }
 0x27d   : > { %v1044_v22 = vpack.c.bf16 %v2013_v21, %v2012_v15  ;;  %v933_v23 = vpop.f32.mrb[71].mxu0 }
 0x27e   : > { %v1043_v25 = vpack.c.bf16 %v933_v23, %v930_v16 }
 0x28a   : > { %v2016_v43 = vpop.f32.mrb[72].mxu0 }
 0x28b   : > { %v946_v46 = vpop.f32.mrb[73].mxu0 }
 0x28c   : > { %v2017_v47 = vpop.f32.mrb[74].mxu0 }
 0x28d   : > { %v1046_v50 = vpack.c.bf16 %v2017_v47, %v2016_v43  ;;  %v949_v56 = vpop.f32.mrb[75].mxu0 }
 0x28e   : > { %v1045_v57 = vpack.c.bf16 %v949_v56, %v946_v46 }
 0x29a   : > { %v2020_v58 = vpop.f32.mrb[76].mxu0 }
 0x29b   : > { %v962_v11 = vpop.f32.mrb[77].mxu0 }
 0x29c   : > { %v2021_v59 = vpop.f32.mrb[78].mxu0 }
 0x29d   : > { %v1048_v60 = vpack.c.bf16 %v2021_v59, %v2020_v58  ;;  %v965_v61 = vpop.f32.mrb[79].mxu0 }
 0x29e   : > { %v1047_v62 = vpack.c.bf16 %v965_v61, %v962_v11 }
 0x2aa   : > { %v2024_v63 = vpop.f32.mrb[0].mxu1 }
 0x2ab   : > { %v978_v0 = vpop.f32.mrb[1].mxu1 }
 0x2ac   : > { %v2025_v1 = vpop.f32.mrb[2].mxu1 }
 0x2ad   : > { %v1050_v2 = vpack.c.bf16 %v2025_v1, %v2024_v63  ;;  %v981_v3 = vpop.f32.mrb[3].mxu1 }
 0x2ae   : > { %v1049_v4 = vpack.c.bf16 %v981_v3, %v978_v0 }
 0x2b0   : > { %1878 = vmatprep.subr.bf16.mxu1 %v1049_v4 }
 0x2b1   : > { %1879 = vmatpush3.bf16.msra.mxu1 %v1041_v14 }
 0x2b2   : > { %1880 = vmatprep.subr.bf16.mxu1 %v1050_v2 }
 0x2b5   : > { %1881 = vmatpush3.bf16.msra.mxu1 %v1042_v12 }
 0x2ba   : > { %v2028_v5 = vpop.f32.mrb[4].mxu1 }
 0x2bb   : > { %v994_v6 = vpop.f32.mrb[5].mxu1 }
 0x2bc   : > { %v2029_v7 = vpop.f32.mrb[6].mxu1 }
 0x2bd   : > { %v1052_v8 = vpack.c.bf16 %v2029_v7, %v2028_v5  ;;  %v997_v9 = vpop.f32.mrb[7].mxu1 }
 0x2be   : > { %v1051_v10 = vpack.c.bf16 %v997_v9, %v994_v6 }
 0x2c0   : > { %1882 = vmatprep.subr.bf16.mxu1 %v1051_v10 }
 0x2c1   : > { %1883 = vmatpush3.bf16.msra.mxu1 %v1043_v25 }
 0x2c2   : > { %1884 = vmatprep.subr.bf16.mxu1 %v1052_v8 }
 0x2c5   : > { %1885 = vmatpush3.bf16.msra.mxu1 %v1044_v22 }
 0x2ca   : > { %v2032_v13 = vpop.f32.mrb[8].mxu1 }
 0x2cb   : > { %v1010_v15 = vpop.f32.mrb[9].mxu1 }
 0x2cc   : > { %v2033_v16 = vpop.f32.mrb[10].mxu1 }
 0x2cd   : > { %v1054_v21 = vpack.c.bf16 %v2033_v16, %v2032_v13  ;;  %v1013_v23 = vpop.f32.mrb[11].mxu1 }
 0x2ce   : > { %v1053_v43 = vpack.c.bf16 %v1013_v23, %v1010_v15 }
 0x2d0   : > { %1886 = vmatprep.subr.bf16.mxu1 %v1053_v43 }
 0x2d1   : > { %1887 = vmatpush3.bf16.msra.mxu1 %v1045_v57 }
 0x2d2   : > { %1888 = vmatprep.subr.bf16.mxu1 %v1054_v21 }
 0x2d5   : > { %1889 = vmatpush3.bf16.msra.mxu1 %v1046_v50 }
 0x2da   : > { %v2036_v12 = vpop.f32.mrb[12].mxu1 }
 0x2db   : > { %v1026_v14 = vpop.f32.mrb[13].mxu1 }
 0x2dc   : > { %v2037_v46 = vpop.f32.mrb[14].mxu1 }
 0x2dd   : > { %v1056_v47 = vpack.c.bf16 %v2037_v46, %v2036_v12  ;;  %v1029_v56 = vpop.f32.mrb[15].mxu1 }
 0x2de   : > { %v1055_v58 = vpack.c.bf16 %v1029_v56, %v1026_v14 }
 0x2e0   : > { %1890 = vmatprep.subr.bf16.mxu1 %v1055_v58 }
 0x2e1   : > { %1891 = vmatpush3.bf16.msra.mxu1 %v1047_v62 }
 0x2e2   : > { %1892 = vmatprep.subr.bf16.mxu1 %v1056_v47 }
 0x2e5   : > { %1893 = vmatpush3.bf16.msra.mxu1 %v1048_v60 }
 0x2e8   : > { %1090 = vmatmul.mubr.bf16.vlgmr.msra.gmra.mrb[16].mxu1 %v2755_v17 }
 0x2e9   : > { %1097 = vmatprep.mubr.bf16.mxu1 %v2758_v18 }
 0x2f0   : > { %1098 = vmatmul.mubr.bf16.gmra.mrb[20].mxu1 %v2763_v19 }
 0x2f1   : > { %1105 = vmatprep.mubr.bf16.mxu1 %v2766_v20 }
 0x2f8   : > { %1106 = vmatmul.mubr.bf16.gmra.mrb[24].mxu1 %v2771_v24 }
 0x2f9   : > { %1113 = vmatprep.mubr.bf16.mxu1 %v2774_v26 }
 0x300   : > { %1114 = vmatmul.mubr.bf16.gmra.mrb[28].mxu1 %v2779_v27 }
 0x301   : > { %1121 = vmatprep.mubr.bf16.mxu1 %v2782_v28 }
 0x308   : > { %1122 = vmatmul.mubr.bf16.gmra.mrb[32].mxu1 %v2787_v29 }
 0x309   : > { %1129 = vmatprep.mubr.bf16.mxu1 %v2790_v30 }
 0x310   : > { %1130 = vmatmul.mubr.bf16.gmra.mrb[36].mxu1 %v2795_v31 }
 0x311   : > { %1137 = vmatprep.mubr.bf16.mxu1 %v2798_v32 }
 0x318   : > { %1138 = vmatmul.mubr.bf16.gmra.mrb[40].mxu1 %v2803_v33 }
 0x319   : > { %1145 = vmatprep.mubr.bf16.mxu1 %v2806_v34 }
 0x320   : > { %1146 = vmatmul.mubr.bf16.gmra.mrb[44].mxu1 %v2811_v35 }
 0x321   : > { %1153 = vmatprep.mubr.bf16.mxu1 %v2814_v36 }
 0x328   : > { %1154 = vmatmul.mubr.bf16.gmra.mrb[48].mxu1 %v2819_v37 }
 0x329   : > { %1161 = vmatprep.mubr.bf16.mxu1 %v2822_v38 }
 0x330   : > { %1162 = vmatmul.mubr.bf16.gmra.mrb[52].mxu1 %v2827_v39 }
 0x331   : > { %1169 = vmatprep.mubr.bf16.mxu1 %v2830_v40 }
 0x338   : > { %1170 = vmatmul.mubr.bf16.gmra.mrb[56].mxu1 %v2835_v41 }
 0x339   : > { %1177 = vmatprep.mubr.bf16.mxu1 %v2838_v42 }
 0x340   : > { %1178 = vmatmul.mubr.bf16.gmra.mrb[60].mxu1 %v2843_v44 }
 0x341   : > { %1185 = vmatprep.mubr.bf16.mxu1 %v2846_v45 }
 0x348   : > { %1186 = vmatmul.mubr.bf16.gmra.mrb[64].mxu1 %v2851_v48 }
 0x349   : > { %1193 = vmatprep.mubr.bf16.mxu1 %v2854_v49 }
 0x350   : > { %1194 = vmatmul.mubr.bf16.gmra.mrb[68].mxu1 %v2859_v51 }
 0x351   : > { %1201 = vmatprep.mubr.bf16.mxu1 %v2862_v52 }
 0x358   : > { %1202 = vmatmul.mubr.bf16.gmra.mrb[72].mxu1 %v2867_v53 }
 0x359   : > { %1209 = vmatprep.mubr.bf16.mxu1 %v2870_v54 }
 0x360   : > { %1210 = vmatmul.mubr.bf16.gmra.mrb[76].mxu1 %v2875_v55 }
 0x3bb   : > { %v1894_v17 = vpop.f32.mrb[16].mxu1 }
 0x3bc   : > { %v1895_v18 = vpop.f32.mrb[17].mxu1 }
 0x3bd   : > { %v2910_v19 = vadd.f32 %v1895_v18, %v1894_v17  ;;  %v1897_v20 = vpop.f32.mrb[18].mxu1 }
 0x3be   : > { %v1898_v24 = vpop.f32.mrb[19].mxu1 }
 0x3bf   : > { %v2912_v26 = vadd.f32 %v1898_v24, %v1897_v20  ;;  %v1218_v27 = vmul.f32 %v2910_v19, %v2910_v19 }
 0x3c1   : > { %1250 = vadd.xlane.f32.xlu0 %v1218_v27  ;;  %v1219_v29 = vmul.f32 %v2912_v26, %v2912_v26 }
 0x3c3   : > { %v1900_v28 = vpop.f32.mrb[20].mxu1 }
 0x3c4   : > { %v1901_v30 = vpop.f32.mrb[21].mxu1 }
 0x3c5   : > { %v2918_v31 = vadd.f32 %v1901_v30, %v1900_v28  ;;  %v1903_v32 = vpop.f32.mrb[22].mxu1  ;;  %1252 = vadd.xlane.f32.xlu0 %v1219_v29 }
 0x3c6   : > { %v1904_v33 = vpop.f32.mrb[23].mxu1 }
 0x3c7   : > { %v2920_v34 = vadd.f32 %v1904_v33, %v1903_v32  ;;  %v1220_v35 = vmul.f32 %v2918_v31, %v2918_v31 }
 0x3c9   : > { %1254 = vadd.xlane.f32.xlu1 %v1220_v35  ;;  %v1221_v37 = vmul.f32 %v2920_v34, %v2920_v34 }
 0x3cb   : > { %v1906_v36 = vpop.f32.mrb[24].mxu1 }
 0x3cc   : > { %v1907_v38 = vpop.f32.mrb[25].mxu1 }
 0x3cd   : > { %v2926_v39 = vadd.f32 %v1907_v38, %v1906_v36  ;;  %v1909_v40 = vpop.f32.mrb[26].mxu1  ;;  %1256 = vadd.xlane.f32.xlu1 %v1221_v37 }
 0x3ce   : > { %v1910_v41 = vpop.f32.mrb[27].mxu1 }
 0x3cf   : > { %v2928_v42 = vadd.f32 %v1910_v41, %v1909_v40  ;;  %v1222_v44 = vmul.f32 %v2926_v39, %v2926_v39 }
 0x3d1   : > { %1258 = vadd.xlane.f32.xlu0 %v1222_v44  ;;  %v1223_v45 = vmul.f32 %v2928_v42, %v2928_v42 }
 0x3d3   : > { %v1912_v48 = vpop.f32.mrb[28].mxu1  ;;  %1260 = vadd.xlane.f32.xlu1 %v1223_v45 }
 0x3d4   : > { %v1913_v49 = vpop.f32.mrb[29].mxu1 }
 0x3d5   : > { %v2934_v51 = vadd.f32 %v1913_v49, %v1912_v48  ;;  %v1915_v52 = vpop.f32.mrb[30].mxu1 }
 0x3d6   : > { %v1916_v53 = vpop.f32.mrb[31].mxu1 }
 0x3d7   : > { %v2936_v54 = vadd.f32 %v1916_v53, %v1915_v52  ;;  %v1224_v55 = vmul.f32 %v2934_v51, %v2934_v51 }
 0x3d9   : > { %1262 = vadd.xlane.f32.xlu0 %v1224_v55  ;;  %v1225_v22 = vmul.f32 %v2936_v54, %v2936_v54 }
 0x3db   : > { %v1918_v25 = vpop.f32.mrb[32].mxu1  ;;  %1264 = vadd.xlane.f32.xlu1 %v1225_v22 }
 0x3dc   : > { %v1919_v50 = vpop.f32.mrb[33].mxu1 }
 0x3dd   : > { %v2942_v57 = vadd.f32 %v1919_v50, %v1918_v25  ;;  %v1921_v11 = vpop.f32.mrb[34].mxu1 }
 0x3de   : > { %v1922_v59 = vpop.f32.mrb[35].mxu1 }
 0x3df   : > { %v2944_v60 = vadd.f32 %v1922_v59, %v1921_v11  ;;  %v1226_v61 = vmul.f32 %v2942_v57, %v2942_v57 }
 0x3e1   : > { %1266 = vadd.xlane.f32.xlu0 %v1226_v61  ;;  %v1227_v62 = vmul.f32 %v2944_v60, %v2944_v60 }
 0x3e3   : > { %v1924_v63 = vpop.f32.mrb[36].mxu1  ;;  %1268 = vadd.xlane.f32.xlu1 %v1227_v62 }
 0x3e4   : > { %v1925_v0 = vpop.f32.mrb[37].mxu1 }
 0x3e5   : > { %v2950_v1 = vadd.f32 %v1925_v0, %v1924_v63  ;;  %v1927_v2 = vpop.f32.mrb[38].mxu1 }
 0x3e6   : > { %v1928_v3 = vpop.f32.mrb[39].mxu1 }
 0x3e7   : > { %v2952_v4 = vadd.f32 %v1928_v3, %v1927_v2  ;;  %v1228_v5 = vmul.f32 %v2950_v1, %v2950_v1 }
 0x3e9   : > { %1270 = vadd.xlane.f32.xlu0 %v1228_v5  ;;  %v1229_v6 = vmul.f32 %v2952_v4, %v2952_v4 }
 0x3eb   : > { %v1930_v7 = vpop.f32.mrb[40].mxu1  ;;  %1272 = vadd.xlane.f32.xlu1 %v1229_v6 }
 0x3ec   : > { %v1931_v8 = vpop.f32.mrb[41].mxu1 }
 0x3ed   : > { %v2958_v9 = vadd.f32 %v1931_v8, %v1930_v7  ;;  %v1933_v10 = vpop.f32.mrb[42].mxu1 }
 0x3ee   : > { %v1934_v13 = vpop.f32.mrb[43].mxu1 }
 0x3ef   : > { %v2960_v15 = vadd.f32 %v1934_v13, %v1933_v10  ;;  %v1230_v16 = vmul.f32 %v2958_v9, %v2958_v9 }
 0x3f1   : > { %1274 = vadd.xlane.f32.xlu0 %v1230_v16  ;;  %v1231_v21 = vmul.f32 %v2960_v15, %v2960_v15 }
 0x3f3   : > { %v1936_v23 = vpop.f32.mrb[44].mxu1  ;;  %1276 = vadd.xlane.f32.xlu1 %v1231_v21 }
 0x3f4   : > { %v1937_v43 = vpop.f32.mrb[45].mxu1 }
 0x3f5   : > { %v2966_v12 = vadd.f32 %v1937_v43, %v1936_v23  ;;  %v1939_v14 = vpop.f32.mrb[46].mxu1 }
 0x3f6   : > { %v1940_v46 = vpop.f32.mrb[47].mxu1 }
 0x3f7   : > { %v2968_v47 = vadd.f32 %v1940_v46, %v1939_v14  ;;  %v1232_v56 = vmul.f32 %v2966_v12, %v2966_v12 }
 0x3f9   : > { %1278 = vadd.xlane.f32.xlu0 %v1232_v56  ;;  %v1233_v58 = vmul.f32 %v2968_v47, %v2968_v47 }
 0x3fb   : > { %v1942_v17 = vpop.f32.mrb[48].mxu1  ;;  %1280 = vadd.xlane.f32.xlu1 %v1233_v58 }
 0x3fc   : > { %v1943_v18 = vpop.f32.mrb[49].mxu1 }
 0x3fd   : > { %v2974_v20 = vadd.f32 %v1943_v18, %v1942_v17  ;;  %v1945_v24 = vpop.f32.mrb[50].mxu1 }
 0x3fe   : > { %v1946_v27 = vpop.f32.mrb[51].mxu1 }
 0x3ff   : > { %v2976_v28 = vadd.f32 %v1946_v27, %v1945_v24  ;;  %v1234_v29 = vmul.f32 %v2974_v20, %v2974_v20 }
 0x401   : > { %1282 = vadd.xlane.f32.xlu0 %v1234_v29  ;;  %v1235_v30 = vmul.f32 %v2976_v28, %v2976_v28 }
 0x403   : > { %v1948_v32 = vpop.f32.mrb[52].mxu1  ;;  %1284 = vadd.xlane.f32.xlu1 %v1235_v30 }
 0x404   : > { %v1949_v33 = vpop.f32.mrb[53].mxu1 }
 0x405   : > { %v2982_v35 = vadd.f32 %v1949_v33, %v1948_v32  ;;  %v1951_v36 = vpop.f32.mrb[54].mxu1 }
 0x406   : > { %v1952_v37 = vpop.f32.mrb[55].mxu1 }
 0x407   : > { %v2984_v38 = vadd.f32 %v1952_v37, %v1951_v36  ;;  %v1236_v40 = vmul.f32 %v2982_v35, %v2982_v35 }
 0x409   : > { %1286 = vadd.xlane.f32.xlu0 %v1236_v40  ;;  %v1237_v41 = vmul.f32 %v2984_v38, %v2984_v38 }
 0x40b   : > { %v1954_v44 = vpop.f32.mrb[56].mxu1  ;;  %1288 = vadd.xlane.f32.xlu1 %v1237_v41 }
 0x40c   : > { %v1955_v45 = vpop.f32.mrb[57].mxu1 }
 0x40d   : > { %v2990_v48 = vadd.f32 %v1955_v45, %v1954_v44  ;;  %v1957_v49 = vpop.f32.mrb[58].mxu1 }
 0x40e   : > { %v1958_v52 = vpop.f32.mrb[59].mxu1 }
 0x40f   : > { %v2992_v53 = vadd.f32 %v1958_v52, %v1957_v49  ;;  %v1238_v55 = vmul.f32 %v2990_v48, %v2990_v48 }
 0x411   : > { %1290 = vadd.xlane.f32.xlu0 %v1238_v55  ;;  %v1239_v22 = vmul.f32 %v2992_v53, %v2992_v53 }
 0x413   : > { %v1960_v25 = vpop.f32.mrb[60].mxu1  ;;  %1292 = vadd.xlane.f32.xlu1 %v1239_v22 }
 0x414   : > { %v1961_v50 = vpop.f32.mrb[61].mxu1 }
 0x415   : > { %v2998_v11 = vadd.f32 %v1961_v50, %v1960_v25  ;;  %v1963_v59 = vpop.f32.mrb[62].mxu1 }
 0x416   : > { %v1964_v61 = vpop.f32.mrb[63].mxu1 }
 0x417   : > { %v3000_v62 = vadd.f32 %v1964_v61, %v1963_v59  ;;  %v1240_v63 = vmul.f32 %v2998_v11, %v2998_v11 }
 0x419   : > { %1294 = vadd.xlane.f32.xlu0 %v1240_v63  ;;  %v1241_v0 = vmul.f32 %v3000_v62, %v3000_v62 }
 0x41b   : > { %v1966_v2 = vpop.f32.mrb[64].mxu1  ;;  %1296 = vadd.xlane.f32.xlu1 %v1241_v0 }
 0x41c   : > { %v1967_v3 = vpop.f32.mrb[65].mxu1 }
 0x41d   : > { %v3006_v5 = vadd.f32 %v1967_v3, %v1966_v2  ;;  %v1969_v6 = vpop.f32.mrb[66].mxu1 }
 0x41e   : > { %v1970_v7 = vpop.f32.mrb[67].mxu1 }
 0x41f   : > { %v3008_v8 = vadd.f32 %v1970_v7, %v1969_v6  ;;  %v1242_v10 = vmul.f32 %v3006_v5, %v3006_v5 }
 0x421   : > { %1298 = vadd.xlane.f32.xlu0 %v1242_v10  ;;  %v1243_v13 = vmul.f32 %v3008_v8, %v3008_v8 }
 0x423   : > { %v1972_v16 = vpop.f32.mrb[68].mxu1  ;;  %1300 = vadd.xlane.f32.xlu1 %v1243_v13 }
 0x424   : > { %v1973_v21 = vpop.f32.mrb[69].mxu1 }
 0x425   : > { %v3014_v23 = vadd.f32 %v1973_v21, %v1972_v16  ;;  %v1975_v43 = vpop.f32.mrb[70].mxu1 }
 0x426   : > { %v1976_v14 = vpop.f32.mrb[71].mxu1 }
 0x427   : > { %v3016_v46 = vadd.f32 %v1976_v14, %v1975_v43  ;;  %v1244_v56 = vmul.f32 %v3014_v23, %v3014_v23 }
 0x429   : > { %1302 = vadd.xlane.f32.xlu0 %v1244_v56  ;;  %v1245_v58 = vmul.f32 %v3016_v46, %v3016_v46 }
 0x42b   : > { %v1978_v17 = vpop.f32.mrb[72].mxu1  ;;  %1304 = vadd.xlane.f32.xlu1 %v1245_v58 }
 0x42c   : > { %v1979_v18 = vpop.f32.mrb[73].mxu1 }
 0x42d   : > { %v3022_v24 = vadd.f32 %v1979_v18, %v1978_v17  ;;  %v1981_v27 = vpop.f32.mrb[74].mxu1 }
 0x42e   : > { %v1982_v29 = vpop.f32.mrb[75].mxu1 }
 0x42f   : > { %v3024_v30 = vadd.f32 %v1982_v29, %v1981_v27  ;;  %v1246_v32 = vmul.f32 %v3022_v24, %v3022_v24 }
 0x431   : > { %1306 = vadd.xlane.f32.xlu0 %v1246_v32  ;;  %v1247_v33 = vmul.f32 %v3024_v30, %v3024_v30 }
 0x433   : > { %v1984_v36 = vpop.f32.mrb[76].mxu1  ;;  %1308 = vadd.xlane.f32.xlu1 %v1247_v33 }
 0x434   : > { %v1985_v37 = vpop.f32.mrb[77].mxu1 }
 0x435   : > { %v3030_v40 = vadd.f32 %v1985_v37, %v1984_v36  ;;  %v1987_v41 = vpop.f32.mrb[78].mxu1 }
 0x436   : > { %v1988_v44 = vpop.f32.mrb[79].mxu1 }
 0x437   : > { %v3032_v45 = vadd.f32 %v1988_v44, %v1987_v41  ;;  %v1248_v49 = vmul.f32 %v3030_v40, %v3030_v40 }
 0x439   : > { %1310 = vadd.xlane.f32.xlu0 %v1248_v49  ;;  %v1249_v52 = vmul.f32 %v3032_v45, %v3032_v45 }
 0x43b   : > { %1312 = vadd.xlane.f32.xlu1 %v1249_v52 }
 0x44e   : > { %v1251_v55 = vpop.xlane.xlu0 %1250 }
 0x44f   : > { %v1314_v22 = vmax.f32 %v1251_v55, 1e-24 }
 0x451   : > { %2200 = vrsqrt.f32 %v1314_v22 }
 0x452   : > { %v1253_v25 = vpop.xlane.xlu0 %1252 }
 0x453   : > { %v1315_v50 = vmax.f32 %v1253_v25, 1e-24 }
 0x455   : > { %2202 = vrsqrt.f32 %v1315_v50 }
 0x456   : > { %v1255_v59 = vpop.xlane.xlu1 %1254 }
 0x457   : > { %v1316_v61 = vmax.f32 %v1255_v59, 1e-24 }
 0x459   : > { %2204 = vrsqrt.f32 %v1316_v61 }
 0x45a   : > { %v1257_v63 = vpop.xlane.xlu1 %1256 }
 0x45b   : > { %v2201_v0 = vpop.eup %2200  ;;  %v1317_v2 = vmax.f32 %v1257_v63, 1e-24 }
 0x45c   : > { %v1378_v3 = vmul.f32 %v2201_v0, %v2910_v19 }
 0x45d   : > { %2206 = vrsqrt.f32 %v1317_v2 }
 0x45e   : > { %1410 = vst [vmem:[%s3041_s8] sm:$0xff] %v1378_v3  ;;  %v1259_v6 = vpop.xlane.xlu0 %1258 }
 0x45f   : > { %v2203_v7 = vpop.eup %2202  ;;  %v1318_v10 = vmax.f32 %v1259_v6, 1e-24 }
 0x460   : > { %v1379_v13 = vmul.f32 %v2203_v7, %v2912_v26  ;;  %v1261_v16 = vpop.xlane.xlu1 %1260 }
 0x461   : > { %2208 = vrsqrt.f32 %v1318_v10  ;;  %v1319_v21 = vmax.f32 %v1261_v16, 1e-24 }
 0x462   : > { %1411 = vst [vmem:[%s3041_s8 + $0x8] sm:$0xff] %v1379_v13 }
 0x463   : > { %v2205_v43 = vpop.eup %2204  ;;  %2210 = vrsqrt.f32 %v1319_v21 }
 0x464   : > { %v1380_v19 = vmul.f32 %v2205_v43, %v2918_v31 }
 0x466   : > { %1412 = vst [vmem:[%s3041_s8 + $0x10] sm:$0xff] %v1380_v19  ;;  %v1263_v14 = vpop.xlane.xlu0 %1262 }
 0x467   : > { %v2207_v56 = vpop.eup %2206  ;;  %v1320_v58 = vmax.f32 %v1263_v14, 1e-24 }
 0x468   : > { %v1381_v17 = vmul.f32 %v2207_v56, %v2920_v34  ;;  %v1265_v18 = vpop.xlane.xlu1 %1264 }
 0x469   : > { %2212 = vrsqrt.f32 %v1320_v58  ;;  %v1321_v26 = vmax.f32 %v1265_v18, 1e-24 }
 0x46a   : > { %1413 = vst [vmem:[%s3041_s8 + $0x18] sm:$0xff] %v1381_v17 }
 0x46b   : > { %v2209_v27 = vpop.eup %2208  ;;  %2214 = vrsqrt.f32 %v1321_v26 }
 0x46c   : > { %v1382_v29 = vmul.f32 %v2209_v27, %v2926_v39 }
 0x46d   : > { %v2211_v32 = vpop.eup %2210 }
 0x46e   : > { %1414 = vst [vmem:[%s3041_s8 + $0x20] sm:$0xff] %v1382_v29  ;;  %v1383_v31 = vmul.f32 %v2211_v32, %v2928_v42  ;;  %v1267_v33 = vpop.xlane.xlu0 %1266 }
 0x46f   : > { %v1322_v36 = vmax.f32 %v1267_v33, 1e-24 }
 0x470   : > { %1415 = vst [vmem:[%s3041_s8 + $0x28] sm:$0xff] %v1383_v31  ;;  %v1269_v37 = vpop.xlane.xlu1 %1268 }
 0x471   : > { %2216 = vrsqrt.f32 %v1322_v36  ;;  %v1323_v34 = vmax.f32 %v1269_v37, 1e-24 }
 0x473   : > { %v2213_v41 = vpop.eup %2212  ;;  %2218 = vrsqrt.f32 %v1323_v34 }
 0x474   : > { %v1384_v44 = vmul.f32 %v2213_v41, %v2934_v51 }
 0x475   : > { %v2215_v49 = vpop.eup %2214 }
 0x476   : > { %1416 = vst [vmem:[%s3041_s8 + $0x30] sm:$0xff] %v1384_v44  ;;  %v1385_v39 = vmul.f32 %v2215_v49, %v2936_v54  ;;  %v1271_v52 = vpop.xlane.xlu0 %1270 }
 0x477   : > { %v1324_v55 = vmax.f32 %v1271_v52, 1e-24 }
 0x478   : > { %1417 = vst [vmem:[%s3041_s8 + $0x38] sm:$0xff] %v1385_v39  ;;  %v1273_v42 = vpop.xlane.xlu1 %1272 }
 0x479   : > { %2220 = vrsqrt.f32 %v1324_v55  ;;  %v1325_v22 = vmax.f32 %v1273_v42, 1e-24 }
 0x47b   : > { %v2217_v25 = vpop.eup %2216  ;;  %2222 = vrsqrt.f32 %v1325_v22 }
 0x47c   : > { %v1386_v50 = vmul.f32 %v2217_v25, %v2942_v57 }
 0x47d   : > { %v2219_v59 = vpop.eup %2218 }
 0x47e   : > { %1418 = vst [vmem:[%s3041_s8 + $0x40] sm:$0xff] %v1386_v50  ;;  %v1387_v51 = vmul.f32 %v2219_v59, %v2944_v60  ;;  %v1275_v61 = vpop.xlane.xlu0 %1274 }
 0x47f   : > { %v1326_v63 = vmax.f32 %v1275_v61, 1e-24 }
 0x480   : > { %1419 = vst [vmem:[%s3041_s8 + $0x48] sm:$0xff] %v1387_v51  ;;  %v1277_v54 = vpop.xlane.xlu1 %1276 }
 0x481   : > { %2224 = vrsqrt.f32 %v1326_v63  ;;  %v1327_v0 = vmax.f32 %v1277_v54, 1e-24 }
 0x483   : > { %v2221_v2 = vpop.eup %2220  ;;  %2226 = vrsqrt.f32 %v1327_v0 }
 0x484   : > { %v1388_v3 = vmul.f32 %v2221_v2, %v2950_v1 }
 0x485   : > { %v2223_v6 = vpop.eup %2222 }
 0x486   : > { %1420 = vst [vmem:[%s3041_s8 + $0x50] sm:$0xff] %v1388_v3  ;;  %v1389_v57 = vmul.f32 %v2223_v6, %v2952_v4  ;;  %v1279_v7 = vpop.xlane.xlu0 %1278 }
 0x487   : > { %v1328_v10 = vmax.f32 %v1279_v7, 1e-24 }
 0x488   : > { %1421 = vst [vmem:[%s3041_s8 + $0x58] sm:$0xff] %v1389_v57  ;;  %v1281_v60 = vpop.xlane.xlu1 %1280 }
 0x489   : > { %2228 = vrsqrt.f32 %v1328_v10  ;;  %v1329_v13 = vmax.f32 %v1281_v60, 1e-24 }
 0x48b   : > { %v2225_v16 = vpop.eup %2224  ;;  %2230 = vrsqrt.f32 %v1329_v13 }
 0x48c   : > { %v1390_v21 = vmul.f32 %v2225_v16, %v2958_v9 }
 0x48d   : > { %v2227_v43 = vpop.eup %2226 }
 0x48e   : > { %1422 = vst [vmem:[%s3041_s8 + $0x60] sm:$0xff] %v1390_v21  ;;  %v1391_v1 = vmul.f32 %v2227_v43, %v2960_v15  ;;  %v1283_v19 = vpop.xlane.xlu0 %1282 }
 0x48f   : > { %v1330_v14 = vmax.f32 %v1283_v19, 1e-24 }
 0x490   : > { %1423 = vst [vmem:[%s3041_s8 + $0x68] sm:$0xff] %v1391_v1  ;;  %v1285_v4 = vpop.xlane.xlu1 %1284 }
 0x491   : > { %2232 = vrsqrt.f32 %v1330_v14  ;;  %v1331_v56 = vmax.f32 %v1285_v4, 1e-24 }
 0x493   : > { %v2229_v58 = vpop.eup %2228  ;;  %2234 = vrsqrt.f32 %v1331_v56 }
 0x494   : > { %v1392_v17 = vmul.f32 %v2229_v58, %v2966_v12 }
 0x495   : > { %v2231_v18 = vpop.eup %2230 }
 0x496   : > { %1424 = vst [vmem:[%s3041_s8 + $0x70] sm:$0xff] %v1392_v17  ;;  %v1393_v9 = vmul.f32 %v2231_v18, %v2968_v47  ;;  %v1287_v26 = vpop.xlane.xlu0 %1286 }
 0x497   : > { %v1332_v27 = vmax.f32 %v1287_v26, 1e-24 }
 0x498   : > { %1425 = vst [vmem:[%s3041_s8 + $0x78] sm:$0xff] %v1393_v9  ;;  %v1289_v15 = vpop.xlane.xlu1 %1288 }
 0x499   : > { %2236 = vrsqrt.f32 %v1332_v27  ;;  %v1333_v29 = vmax.f32 %v1289_v15, 1e-24 }
 0x49b   : > { %v2233_v32 = vpop.eup %2232  ;;  %2238 = vrsqrt.f32 %v1333_v29 }
 0x49c   : > { %v1394_v31 = vmul.f32 %v2233_v32, %v2974_v20 }
 0x49d   : > { %v2235_v33 = vpop.eup %2234 }
 0x49e   : > { %1426 = vst [vmem:[%s3041_s8 + $0x80] sm:$0xff] %v1394_v31  ;;  %v1395_v12 = vmul.f32 %v2235_v33, %v2976_v28  ;;  %v1291_v36 = vpop.xlane.xlu0 %1290 }
 0x49f   : > { %v1334_v37 = vmax.f32 %v1291_v36, 1e-24 }
 0x4a0   : > { %1427 = vst [vmem:[%s3041_s8 + $0x88] sm:$0xff] %v1395_v12  ;;  %v1293_v47 = vpop.xlane.xlu1 %1292 }
 0x4a1   : > { %2240 = vrsqrt.f32 %v1334_v37  ;;  %v1335_v34 = vmax.f32 %v1293_v47, 1e-24 }
 0x4a3   : > { %v2237_v41 = vpop.eup %2236  ;;  %2242 = vrsqrt.f32 %v1335_v34 }
 0x4a4   : > { %v1396_v44 = vmul.f32 %v2237_v41, %v2982_v35 }
 0x4a5   : > { %v2239_v49 = vpop.eup %2238 }
 0x4a6   : > { %1428 = vst [vmem:[%s3041_s8 + $0x90] sm:$0xff] %v1396_v44  ;;  %v1397_v20 = vmul.f32 %v2239_v49, %v2984_v38  ;;  %v1295_v39 = vpop.xlane.xlu0 %1294 }
 0x4a7   : > { %v1336_v52 = vmax.f32 %v1295_v39, 1e-24 }
 0x4a8   : > { %1429 = vst [vmem:[%s3041_s8 + $0x98] sm:$0xff] %v1397_v20  ;;  %v1297_v28 = vpop.xlane.xlu1 %1296 }
 0x4a9   : > { %2244 = vrsqrt.f32 %v1336_v52  ;;  %v1337_v55 = vmax.f32 %v1297_v28, 1e-24 }
 0x4ab   : > { %v2241_v42 = vpop.eup %2240  ;;  %2246 = vrsqrt.f32 %v1337_v55 }
 0x4ac   : > { %v1398_v22 = vmul.f32 %v2241_v42, %v2990_v48 }
 0x4ad   : > { %v2243_v25 = vpop.eup %2242 }
 0x4ae   : > { %1430 = vst [vmem:[%s3041_s8 + $0xa0] sm:$0xff] %v1398_v22  ;;  %v1399_v35 = vmul.f32 %v2243_v25, %v2992_v53  ;;  %v1299_v50 = vpop.xlane.xlu0 %1298 }
 0x4af   : > { %v1338_v59 = vmax.f32 %v1299_v50, 1e-24 }
 0x4b0   : > { %1431 = vst [vmem:[%s3041_s8 + $0xa8] sm:$0xff] %v1399_v35  ;;  %v1301_v38 = vpop.xlane.xlu1 %1300 }
 0x4b1   : > { %2248 = vrsqrt.f32 %v1338_v59  ;;  %v1339_v51 = vmax.f32 %v1301_v38, 1e-24 }
 0x4b3   : > { %v2245_v61 = vpop.eup %2244  ;;  %2250 = vrsqrt.f32 %v1339_v51 }
 0x4b4   : > { %v1400_v63 = vmul.f32 %v2245_v61, %v2998_v11 }
 0x4b5   : > { %v2247_v54 = vpop.eup %2246 }
 0x4b6   : > { %1432 = vst [vmem:[%s3041_s8 + $0xb0] sm:$0xff] %v1400_v63  ;;  %v1401_v48 = vmul.f32 %v2247_v54, %v3000_v62  ;;  %v1303_v0 = vpop.xlane.xlu0 %1302 }
 0x4b7   : > { %v1340_v2 = vmax.f32 %v1303_v0, 1e-24 }
 0x4b8   : > { %1433 = vst [vmem:[%s3041_s8 + $0xb8] sm:$0xff] %v1401_v48  ;;  %v1305_v53 = vpop.xlane.xlu1 %1304 }
 0x4b9   : > { %2252 = vrsqrt.f32 %v1340_v2  ;;  %v1341_v3 = vmax.f32 %v1305_v53, 1e-24 }
 0x4bb   : > { %v2249_v6 = vpop.eup %2248  ;;  %2254 = vrsqrt.f32 %v1341_v3 }
 0x4bc   : > { %v1402_v57 = vmul.f32 %v2249_v6, %v3006_v5 }
 0x4bd   : > { %v2251_v7 = vpop.eup %2250 }
 0x4be   : > { %1434 = vst [vmem:[%s3041_s8 + $0xc0] sm:$0xff] %v1402_v57  ;;  %v1403_v11 = vmul.f32 %v2251_v7, %v3008_v8  ;;  %v1307_v10 = vpop.xlane.xlu0 %1306 }
 0x4bf   : > { %v1342_v60 = vmax.f32 %v1307_v10, 1e-24 }
 0x4c0   : > { %1435 = vst [vmem:[%s3041_s8 + $0xc8] sm:$0xff] %v1403_v11  ;;  %v1309_v62 = vpop.xlane.xlu1 %1308 }
 0x4c1   : > { %2256 = vrsqrt.f32 %v1342_v60  ;;  %v1343_v13 = vmax.f32 %v1309_v62, 1e-24 }
 0x4c3   : > { %v2253_v16 = vpop.eup %2252  ;;  %2258 = vrsqrt.f32 %v1343_v13 }
 0x4c4   : > { %v1404_v21 = vmul.f32 %v2253_v16, %v3014_v23 }
 0x4c5   : > { %v2255_v43 = vpop.eup %2254 }
 0x4c6   : > { %1436 = vst [vmem:[%s3041_s8 + $0xd0] sm:$0xff] %v1404_v21  ;;  %v1405_v5 = vmul.f32 %v2255_v43, %v3016_v46  ;;  %v1311_v1 = vpop.xlane.xlu0 %1310 }
 0x4c7   : > { %v1344_v8 = vmax.f32 %v1311_v1, 1e-24 }
 0x4c8   : > { %1437 = vst [vmem:[%s3041_s8 + $0xd8] sm:$0xff] %v1405_v5  ;;  %v1313_v19 = vpop.xlane.xlu1 %1312 }
 0x4c9   : > { %2260 = vrsqrt.f32 %v1344_v8  ;;  %v1345_v14 = vmax.f32 %v1313_v19, 1e-24 }
 0x4cb   : > { %v2257_v4 = vpop.eup %2256  ;;  %2262 = vrsqrt.f32 %v1345_v14 }
 0x4cc   : > { %v1406_v23 = vmul.f32 %v2257_v4, %v3022_v24 }
 0x4cd   : > { %v2259_v46 = vpop.eup %2258 }
 0x4ce   : > { %1438 = vst [vmem:[%s3041_s8 + $0xe0] sm:$0xff] %v1406_v23  ;;  %v1407_v56 = vmul.f32 %v2259_v46, %v3024_v30 }
 0x4d0   : > { %1439 = vst [vmem:[%s3041_s8 + $0xe8] sm:$0xff] %v1407_v56 }
 0x4d3   : > { %v2261_v24 = vpop.eup %2260 }
 0x4d4   : > { %v1408_v30 = vmul.f32 %v2261_v24, %v3030_v40 }
 0x4d5   : > { %v2263_v58 = vpop.eup %2262 }
 0x4d6   : > { %1440 = vst [vmem:[%s3041_s8 + $0xf0] sm:$0xff] %v1408_v30  ;;  %v1409_v17 = vmul.f32 %v2263_v58, %v3032_v45 }
 0x4d8   : > { %1441 = vst [vmem:[%s3041_s8 + $0xf8] sm:$0xff] %v1409_v17 }
 0x4d9   : > { %2375 = shalt.err (!%p2372_p9)
}
 0x4da   : > { %s2376_s22 = scalar_lea.hbm %s3111_s20, 4096  ;;  %s2380_s15 = scalar_lea.hbm %s3274_s4, 8192 }
 0x4db   : > { %p2377_p11 = scmp.ne.s32.totalorder %s3111_s20, %s2376_s22  ;;  %p2381_p7 = scmp.lt.u32.totalorder %s3111_s20, %s3274_s4 }
 0x4dc   : > { %p2382_p0 = scmp.lt.u32.totalorder %s2380_s15, %s2376_s22  ;;  %p2384_p6 = scmp.lt.u32.totalorder %s2376_s22, %s3111_s20 }
 0x4dd   : > { %p2378_p13 = pnand %p2377_p11, %p2620_p1 }
 0x4de   : > { %p2383_p2 = por %p2382_p0, %p2381_p7 }
 0x4df   : > { %p2379_p3 = pneg %p2378_p13 }
 0x4e0   : > { %p2385_p10 = por %p2384_p6, %p2383_p2 }
 0x4e2   : > { %p2386_p12 = pnand %p2385_p10, %p2379_p3 }
 0x4e4   : > { %2389 = shalt.err (!%p2386_p12)
}
 0x4e5   : > { %s2481_s2 = smov 128   ;;  %s2482_s25 = smov 8  }
 0x4e6   : > { %s3275_s19 = scalar_lea.sflag [#allocation6], %s2710_s12  ;;  %s1444_s22 = scalar_lea.vmem %s3041_s8, %s3117_s0 [#allocation10] }
 0x4e7   : > { %2062 = dma.vmem_to_hbm [thread:$0]  (%p2620_p1), %s3113_s21, 4096, %s3111_s20, %s3275_s19, %s2481_s2, %s2481_s2, %s2482_s25  }
 0x4e8   : > { %s1449_s1 = scalar_lea.vmem %s3041_s8, %s3119_s3 [#allocation10]  ;;  %s1454_s10 = scalar_lea.vmem %s3041_s8, %s3123_s13 [#allocation10]  ;;  %v1445_v40 = vld [vmem:[%s1444_s22] sm:$0x1] }
 0x4e9   : > { %s1459_s15 = scalar_lea.vmem %s3041_s8, %s3129_s26 [#allocation10]  ;;  %s1464_s7 = scalar_lea.vmem %s3041_s8, %s3131_s27 [#allocation10]  ;;  %v1450_v45 = vld [vmem:[%s1449_s1] sm:$0x1] }
 0x4ea   : > { %s1469_s4 = scalar_lea.vmem %s3041_s8, %s3134_s23 [#allocation10]  ;;  %s3276_s11 = sshll.u32 %s2710_s12, 3  ;;  %v1455_v18 = vld [vmem:[%s1454_s10] sm:$0x1] }
 0x4eb   : > { %s285_s30 = scalar_lea.vmem [#allocation11], %s3276_s11  ;;  %s1474_s14 = scalar_lea.vmem %s3041_s8, %s3138_s24 [#allocation10]  ;;  %v1460_v9 = vld [vmem:[%s1459_s15] sm:$0x1] }
 0x4ec   : > { %s1517_s29 = sshll.u32 %s285_s30, 4  ;;  %s1479_s6 = scalar_lea.vmem %s3041_s8, %s3140_s18 [#allocation10]  ;;  %1446 = vst [vmem:[%s285_s30] sm:$0x1] %v1445_v40  ;;  %1451 = vst [vmem:[%s285_s30 + $0x1] sm:$0x1] %v1450_v45  ;;  %v1465_v26 = vld [vmem:[%s1464_s7] sm:$0x1]  ;;  %s3191_s29 = int_to_ptr.vmem [resolvable:$true] %s1517_s29 }
 0x4ed   : > { %1456 = vst [vmem:[%s285_s30 + $0x2] sm:$0x1] %v1455_v18  ;;  %v1470_v27 = vld [vmem:[%s1469_s4] sm:$0x1]  ;;  %s3189_s0 = scalar_lea.hbm %s3238_s5, %s3099_s16  ;;  %1461 = vst [vmem:[%s285_s30 + $0x3] sm:$0x1] %v1460_v9 }
 0x4ee   : > { %1466 = vst [vmem:[%s285_s30 + $0x4] sm:$0x1] %v1465_v26  ;;  %1471 = vst [vmem:[%s285_s30 + $0x5] sm:$0x1] %v1470_v27  ;;  %v1475_v15 = vld [vmem:[%s1474_s14] sm:$0x1] }
 0x4ef   : > { %v1480_v29 = vld [vmem:[%s1479_s6] sm:$0x1]  ;;  %1476 = vst [vmem:[%s285_s30 + $0x6] sm:$0x1] %v1475_v15  ;;  %s1488_s11 = scalar_lea.sflag [#allocation12], %s2710_s12  ;;  %s2390_s8 = scalar_lea.vmem %s3191_s29, 128 }
 0x4f0   : > { %1481 = vst [vmem:[%s285_s30 + $0x7] sm:$0x1] %v1480_v29  ;;  %p2391_p4 = scmp.ne.s32.totalorder %s3191_s29, %s2390_s8  ;;  %s2483_s4 = smov [#allocation11]  }
 0x4f1   : > { %s2394_s16 = sshll.u32 %s2483_s4, 4  ;;  %s2395_s16 = int_to_ptr.vmem [resolvable:$false] %s2394_s16 }
 0x4f2   : > { %p2392_p8 = pnand %p2391_p4, %p2620_p1  ;;  %s2396_s3 = scalar_lea.vmem %s2395_s16, 256 }
 0x4f3   : > { %p2397_p9 = scmp.lt.s32.totalorder %s3191_s29, %s2395_s16  ;;  %p2398_p11 = scmp.lt.s32.totalorder %s2396_s3, %s2390_s8 }
 0x4f4   : > { %p2393_p5 = pneg %p2392_p8 }
 0x4f5   : > { %p2399_p13 = por %p2398_p11, %p2397_p9 }
 0x4f7   : > { %p2400_p3 = pnand %p2399_p13, %p2393_p5 }
 0x4f9   : > { %2403 = shalt.err (!%p2400_p3)
}
 0x4fa   : > { %s2404_s30 = scalar_lea.hbm %s3189_s0, 128  ;;  %s2408_s12 = scalar_lea.hbm %s3238_s5, 256 }
 0x4fb   : > { %p2405_p7 = scmp.ne.s32.totalorder %s3189_s0, %s2404_s30  ;;  %p2409_p6 = scmp.lt.u32.totalorder %s3189_s0, %s3238_s5 }
 0x4fc   : > { %p2410_p10 = scmp.lt.u32.totalorder %s2408_s12, %s2404_s30  ;;  %p2412_p4 = scmp.lt.u32.totalorder %s2404_s30, %s3189_s0 }
 0x4fd   : > { %p2406_p0 = pnand %p2405_p7, %p2620_p1 }
 0x4fe   : > { %p2411_p12 = por %p2410_p10, %p2409_p6 }
 0x4ff   : > { %p2407_p2 = pneg %p2406_p0 }
 0x500   : > { %p2413_p8 = por %p2412_p4, %p2411_p12 }
 0x502   : > { %p2414_p5 = pnand %p2413_p8, %p2407_p2 }
 0x504   : > { %2417 = shalt.err (!%p2414_p5)
}
 0x505   : > { %2063 = dma.vmem_to_hbm [thread:$0]  (%p2620_p1), %s3191_s29, 128, %s3189_s0, %s1488_s11  }
 0x506 PF: > { %s3277_s27 = sld [smem:[#allocation21_spill]]  ;;  %s1529_s23 = sand.u32 1, %s2458_s28  }
 0x507   : > { %p3278_p9 = scmp.ne.s32.totalorder %s3257_s9, 0  ;;  %s1530_s24 = scalar_lea.sflag [#allocation6], %s1529_s23 }
 0x50c   : > { %p3279_p11 = scmp.ge.s32.totalorder %s3277_s27, 2 }
 0x50e   : > { %p2078_p13 = pnand %p3279_p11, %p3278_p9 }
 0x510   : > { %2449 = dma.done.wait (!%p2078_p13), %s1530_s24, 4096  }
 0x511   : > { %2451 = vsyncadd (!%p2078_p13), %s1530_s24, 4294963200  ;;  %s1539_s18 = scalar_lea.sflag [#allocation12], %s1529_s23 }
 0x512   : > { %2453 = dma.done.wait (!%p2078_p13), %s1539_s18, 128  }
 0x513   : > { %2455 = vsyncadd (!%p2078_p13), %s1539_s18, 4294967168  ;;  %s3280_s6 = sld [smem:[#allocation22_spill]]  ;;  %s3281_s28 = sld [smem:[#allocation19_spill]] }
 0x514   : > { %s3282_s29 = sld [smem:[#allocation20_spill]]  ;;  %s3283_s30 = sld [smem:[#allocation23_spill]] }
 0x519   : > { %p29_p1 = scmp.ge.s32.totalorder %s3280_s6, 4  }
 0x51b   :  { %31 = sbr.rel (!%p29_p1) target bundleno = 22 (0x16), region = 119 }
 0x522   :  { %1544 = vsyncpa [#allocation5], 1 }
 0x523   :  { %1546 = vsyncpa [#allocation5 + $0x1], 1 }
 0x524   :  { %1547 = vsyncpa [#allocation8], 1 }
 0x525   :  { %1549 = vsyncpa [#allocation8 + $0x1], 1 }
 0x526   :  { %1550 = vsyncpa [#allocation6], 1 }
 0x527   :  { %1552 = vsyncpa [#allocation6 + $0x1], 1 }
 0x528   :  { %1553 = vsyncpa [#allocation12], 1 }
 0x529   :  { %1555 = vsyncpa [#allocation12 + $0x1], 1 }

</bundles_post_ra>
